<compile_context>
chip_gen: v7x
topology: tpu7x:2x2x1
jax: 0.10.0
libtpu: 0.0.40
codegen_flags: <defaults>
</compile_context>

<pallas_src>
import math
import functools

import numpy as np
import jax
import jax.numpy as jnp
from jax.experimental import pallas as pl
from jax.experimental.pallas import tpu as pltpu


# ----------------------------------------------------------------------------
# Pallas kernel: all encoder layers for one batch element, one layer per step.
# ----------------------------------------------------------------------------
def _layernorm(x, alpha, bias, eps, d):
    # torch: alpha * (x - mean) / (x.std(dim=-1, unbiased=True) + eps) + bias
    mean = jnp.mean(x, axis=-1, keepdims=True)
    xc = x - mean
    var = jnp.sum(xc * xc, axis=-1, keepdims=True) * (1.0 / (d - 1))
    inv = pl.reciprocal(jnp.sqrt(var) + eps, approx=True)
    return alpha * (xc * inv) + bias


def enc_layers_kernel(
    x_ref, mask_ref,
    wqkv_ref, bqkv_ref, wo_ref, bo_ref,
    w1_ref, b1_ref, w2_ref, b2_ref,
    a1_ref, g1_ref, a2_ref, g2_ref,
    o_ref,
    xres_ref, concat_ref,
    *, heads, d_model, eps,
):
    layer = pl.program_id(1)
    n_layer = pl.num_programs(1)
    d_k = d_model // heads
    scale = 1.0 / math.sqrt(d_k)

    # Load the activation into the layer-resident VMEM scratch at layer 0.
    @pl.when(layer == 0)
    def _():
        xres_ref[...] = x_ref[0]

    x = xres_ref[...]                                       # (S, D) float32
    x_bf = x.astype(jnp.bfloat16)

    # Mask folded into one additive bias (hoisted out of the head loop).
    mask_bias = jnp.where(mask_ref[0] == 0.0, -1e9, 0.0)    # (1, S) over keys

    # Fused QKV projection: one (S, D) @ (D, 3D) MXU pass + one bias add.
    qkv = (jnp.dot(x_bf, wqkv_ref[0], preferred_element_type=jnp.float32)
           + bqkv_ref[0])                                   # (S, 3D) float32

    # Per-head attention; each head's context is written to its lane slot of
    # the concat scratch so the output projection is ONE full-width matmul.
    for h in range(heads):
        q_h = qkv[:, h * d_k:(h + 1) * d_k].astype(jnp.bfloat16)
        k_h = qkv[:, d_model + h * d_k:
                  d_model + (h + 1) * d_k].astype(jnp.bfloat16)
        v_h = qkv[:, 2 * d_model + h * d_k:
                  2 * d_model + (h + 1) * d_k].astype(jnp.bfloat16)
        s = (jnp.dot(q_h, k_h.T, preferred_element_type=jnp.float32) * scale
             + mask_bias)                                   # (S, S) float32
        s_max = jnp.max(s, axis=-1, keepdims=True)
        e = jnp.exp(s - s_max)
        p = e * pl.reciprocal(jnp.sum(e, axis=-1, keepdims=True), approx=True)
        concat_ref[:, h * d_k:(h + 1) * d_k] = jnp.dot(
            p.astype(jnp.bfloat16), v_h, preferred_element_type=jnp.float32)

    # Single output projection over the full model dim (contraction = D).
    attn = (jnp.dot(concat_ref[...].astype(jnp.bfloat16), wo_ref[0],
                    preferred_element_type=jnp.float32) + bo_ref[0])

    # Residual + LayerNorm 1.
    x1 = _layernorm(x + attn, a1_ref[0], g1_ref[0], eps, d_model)

    # Feed-forward: ReLU(x1 @ W1 + b1) @ W2 + b2 (bf16 operands, f32 accum).
    h1 = jnp.maximum(
        jnp.dot(x1.astype(jnp.bfloat16), w1_ref[0],
                preferred_element_type=jnp.float32) + b1_ref[0], 0.0)
    ff = (jnp.dot(h1.astype(jnp.bfloat16), w2_ref[0],
                  preferred_element_type=jnp.float32) + b2_ref[0])

    # Residual + LayerNorm 2; keep resident for the next layer.
    x2 = _layernorm(x1 + ff, a2_ref[0], g2_ref[0], eps, d_model)
    xres_ref[...] = x2

    @pl.when(layer == n_layer - 1)
    def _():
        o_ref[0] = x2


_PARAM_ORDER = ("wqkv", "bqkv", "wo", "bo", "w1", "b1", "w2", "b2",
                "a1", "g1", "a2", "g2")


def transformer_enc_layers(x, mask, stacked, *, heads, eps=1e-6):
    """Run all encoder layers in one pallas_call. x: (B,S,D) f32, mask: (B,1,S)."""
    B, S, D = x.shape
    n_layer = stacked["wqkv"].shape[0]
    kernel = functools.partial(enc_layers_kernel, heads=heads, d_model=D, eps=eps)

    in_specs = [
        pl.BlockSpec((1, S, D), lambda b, l: (b, 0, 0)),   # activation per batch
        pl.BlockSpec((1, 1, S), lambda b, l: (b, 0, 0)),   # mask per batch
    ]
    args = [x, mask]
    for name in _PARAM_ORDER:
        w = stacked[name]
        nd = w.ndim - 1
        in_specs.append(
            pl.BlockSpec((1,) + w.shape[1:],
                         lambda b, l, nd=nd: (l,) + (0,) * nd))
        args.append(w)

    return pl.pallas_call(
        kernel,
        out_shape=jax.ShapeDtypeStruct((B, S, D), jnp.float32),
        grid=(B, n_layer),
        in_specs=in_specs,
        out_specs=pl.BlockSpec((1, S, D), lambda b, l: (b, 0, 0)),
        scratch_shapes=[
            pltpu.VMEM((S, D), jnp.float32),   # layer-resident activation
            pltpu.VMEM((S, D), jnp.float32),   # per-head context concat buffer
        ],
        compiler_params=pltpu.CompilerParams(
            dimension_semantics=("parallel", "arbitrary"),
            vmem_limit_bytes=64 * 1024 * 1024,
        ),
    )(*args)


# ----------------------------------------------------------------------------
# Glue: embedding, positional encoding, model driver.
# ----------------------------------------------------------------------------
@functools.lru_cache(maxsize=None)
def _pos_enc_np(seq_len, d_model):
    # Vectorized, cached replication of TransformerEncModel.pos_enc's table.
    # Returns a NUMPY array so caching it never captures a JAX tracer, even
    # when first evaluated inside a jit trace.
    pos = np.arange(seq_len, dtype=np.float32)[:, None]
    i = np.arange(0, d_model, 2, dtype=np.float32)[None, :]
    pe = np.zeros((seq_len, d_model), dtype=np.float32)
    pe[:, 0::2] = np.sin(pos / 10000.0 ** (2.0 * i / d_model))
    pe[:, 1::2] = np.cos(pos / 10000.0 ** (2.0 * (i + 1.0) / d_model))
    return pe


def positional_encoding(seq_len, d_model):
    return jnp.asarray(_pos_enc_np(seq_len, d_model))


def transformer_enc_model(src, mask, emb_table, stacked, *, heads):
    d_model = emb_table.shape[1]
    x = emb_table[src] * math.sqrt(d_model)                 # (B, S, D) lookup
    x = x + positional_encoding(src.shape[1], d_model)[None]
    return transformer_enc_layers(x, mask, stacked, heads=heads)


# ----------------------------------------------------------------------------
# Pure-JAX reference (same math / dtype policy) to sanity-check the kernel.
# ----------------------------------------------------------------------------
def _model_ref(src, mask, emb_table, stacked, heads, eps=1e-6):
    D = emb_table.shape[1]
    d_k = D // heads
    n_layer = stacked["wqkv"].shape[0]
    B, S = src.shape

    x = emb_table[src] * math.sqrt(D) + positional_encoding(S, D)[None]
    mask_bias = jnp.where(mask == 0.0, -1e9, 0.0)[:, :, None, :]   # (B,1,1,S)

    def ln(h, a, g):
        mean = jnp.mean(h, axis=-1, keepdims=True)
        std = jnp.sqrt(jnp.sum((h - mean) ** 2, axis=-1, keepdims=True) / (D - 1))
        return a * (h - mean) / (std + eps) + g

    def mm(a, w):
        return jnp.dot(a.astype(jnp.bfloat16), w.astype(jnp.bfloat16),
                       preferred_element_type=jnp.float32)

    for l in range(n_layer):
        qkv = mm(x, stacked["wqkv"][l]) + stacked["bqkv"][l]
        q, k, v = qkv[..., :D], qkv[..., D:2 * D], qkv[..., 2 * D:]
        q = q.reshape(B, S, heads, d_k).transpose(0, 2, 1, 3).astype(jnp.bfloat16)
        k = k.reshape(B, S, heads, d_k).transpose(0, 2, 1, 3).astype(jnp.bfloat16)
        v = v.reshape(B, S, heads, d_k).transpose(0, 2, 1, 3).astype(jnp.bfloat16)
        s = jnp.einsum("bhqd,bhkd->bhqk", q, k,
                       preferred_element_type=jnp.float32) / math.sqrt(d_k)
        p = jax.nn.softmax(s + mask_bias, axis=-1)
        o = jnp.einsum("bhqk,bhkd->bhqd", p.astype(jnp.bfloat16), v,
                       preferred_element_type=jnp.float32)
        concat = o.transpose(0, 2, 1, 3).reshape(B, S, D)
        attn = mm(concat, stacked["wo"][l]) + stacked["bo"][l]
        x1 = ln(x + attn, stacked["a1"][l], stacked["g1"][l])
        h1 = jnp.maximum(mm(x1, stacked["w1"][l]) + stacked["b1"][l], 0.0)
        ff = mm(h1, stacked["w2"][l]) + stacked["b2"][l]
        x = ln(x1 + ff, stacked["a2"][l], stacked["g2"][l])
    return x


# ----------------------------------------------------------------------------
# Deterministic parameter init (fold_in counter -> can't run out of keys).
# ----------------------------------------------------------------------------
def init_params(key, n_vocab, d_model, ff, n_layer):
    counter = [0]

    def nxt():
        counter[0] += 1
        return jax.random.fold_in(key, counter[0])

    def w(shape, dtype=jnp.float32):
        return (0.05 * jax.random.normal(nxt(), shape, jnp.float32)).astype(dtype)

    emb = 0.1 * jax.random.normal(nxt(), (n_vocab, d_model), jnp.float32)
    emb = emb.at[0].set(0.0)   # padding_idx=0

    layers = []
    for _ in range(n_layer):
        layers.append({
            "wqkv": w((d_model, 3 * d_model), jnp.bfloat16),   # [Wq | Wk | Wv]
            "bqkv": w((1, 3 * d_model)),
            "wo": w((d_model, d_model), jnp.bfloat16),
            "bo": w((1, d_model)),
            "w1": w((d_model, ff), jnp.bfloat16),
            "b1": w((1, ff)),
            "w2": w((ff, d_model), jnp.bfloat16),
            "b2": w((1, d_model)),
            "a1": jnp.ones((1, d_model), jnp.float32),
            "g1": jnp.zeros((1, d_model), jnp.float32),
            "a2": jnp.ones((1, d_model), jnp.float32),
            "g2": jnp.zeros((1, d_model), jnp.float32),
        })
    stacked = {name: jnp.stack([p[name] for p in layers], axis=0)
               for name in layers[0]}
    return emb, stacked


if __name__ == "__main__":
    B, S = 2, 8
    d_model, heads, ff_dim, n_layer, n_vocab = 32, 4, 64, 2, 16

    key = jax.random.PRNGKey(0)
    k_param, k_src = jax.random.split(key)
    emb_table, stacked = init_params(k_param, n_vocab, d_model, ff_dim, n_layer)

    # src: (B, S) token ids; last two positions of batch element 1 are padding.
    src = jax.random.randint(k_src, (B, S), 1, n_vocab, dtype=jnp.int32)
    src = src.at[1, 6:].set(0)
    # mask: (B, 1, S), 1.0 = valid, 0.0 = padded (torch masked_fill(mask==0)).
    mask = jnp.ones((B, 1, S), jnp.float32)
    mask = mask.at[1, 0, 6:].set(0.0)

    fwd = jax.jit(functools.partial(transformer_enc_model, heads=heads))
    out = jax.block_until_ready(fwd(src, mask, emb_table, stacked))

    ref = _model_ref(src, mask, emb_table, stacked, heads)
    np.testing.assert_allclose(np.asarray(out), np.asarray(ref),
                               rtol=2e-2, atol=2e-2)

    print("KERNEL_OK")
</pallas_src>

<mosaic_0001>
module attributes {stable_mosaic.version = 11 : i64} {
  func.func @enc_layers_kernel(%arg0: i32, %arg1: i32, %arg2: memref<1x8x32xf32, #tpu.memory_space<vmem>>, %arg3: memref<1x1x8xf32, #tpu.memory_space<vmem>>, %arg4: memref<1x32x96xbf16, #tpu.memory_space<vmem>>, %arg5: memref<1x1x96xf32, #tpu.memory_space<vmem>>, %arg6: memref<1x32x32xbf16, #tpu.memory_space<vmem>>, %arg7: memref<1x1x32xf32, #tpu.memory_space<vmem>>, %arg8: memref<1x32x64xbf16, #tpu.memory_space<vmem>>, %arg9: memref<1x1x64xf32, #tpu.memory_space<vmem>>, %arg10: memref<1x64x32xbf16, #tpu.memory_space<vmem>>, %arg11: memref<1x1x32xf32, #tpu.memory_space<vmem>>, %arg12: memref<1x1x32xf32, #tpu.memory_space<vmem>>, %arg13: memref<1x1x32xf32, #tpu.memory_space<vmem>>, %arg14: memref<1x1x32xf32, #tpu.memory_space<vmem>>, %arg15: memref<1x1x32xf32, #tpu.memory_space<vmem>>, %arg16: memref<1x8x32xf32, #tpu.memory_space<vmem>>, %arg17: memref<8x32xf32, #tpu.memory_space<vmem>>, %arg18: memref<8x32xf32, #tpu.memory_space<vmem>>) attributes {dimension_semantics = [#tpu.dimension_semantics<parallel>, #tpu.dimension_semantics<arbitrary>], iteration_bounds = array<i64: 2, 2>, scalar_prefetch = 0 : i64, scratch_operands = 2 : i64, tpu.core_type = #tpu.core_type<tc>, window_params = [{transform_indices = @transform_0, window_bounds = array<i64: 1, 8, 32>}, {transform_indices = @transform_1, window_bounds = array<i64: 1, 1, 8>}, {transform_indices = @transform_2, window_bounds = array<i64: 1, 32, 96>}, {transform_indices = @transform_3, window_bounds = array<i64: 1, 1, 96>}, {transform_indices = @transform_4, window_bounds = array<i64: 1, 32, 32>}, {transform_indices = @transform_5, window_bounds = array<i64: 1, 1, 32>}, {transform_indices = @transform_6, window_bounds = array<i64: 1, 32, 64>}, {transform_indices = @transform_7, window_bounds = array<i64: 1, 1, 64>}, {transform_indices = @transform_8, window_bounds = array<i64: 1, 64, 32>}, {transform_indices = @transform_9, window_bounds = array<i64: 1, 1, 32>}, {transform_indices = @transform_10, window_bounds = array<i64: 1, 1, 32>}, {transform_indices = @transform_11, window_bounds = array<i64: 1, 1, 32>}, {transform_indices = @transform_12, window_bounds = array<i64: 1, 1, 32>}, {transform_indices = @transform_13, window_bounds = array<i64: 1, 1, 32>}, {transform_indices = @transform_14, window_bounds = array<i64: 1, 8, 32>}]} {
    %c0_i32 = arith.constant 0 : i32
    %0 = arith.cmpi eq, %arg1, %c0_i32 : i32
    %1 = arith.extui %0 : i1 to i32
    %c0_i32_0 = arith.constant 0 : i32
    %2 = arith.cmpi ne, %1, %c0_i32_0 : i32
    scf.if %2 {
      %c0_88 = arith.constant 0 : index
      %c0_89 = arith.constant 0 : index
      %c0_90 = arith.constant 0 : index
      %202 = vector.load %arg2[%c0_88, %c0_89, %c0_90] : memref<1x8x32xf32, #tpu.memory_space<vmem>>, vector<1x8x32xf32>
      %203 = vector.shape_cast %202 : vector<1x8x32xf32> to vector<8x32xf32>
      %c0_91 = arith.constant 0 : index
      %c0_92 = arith.constant 0 : index
      %204 = vector.load %arg17[%c0_91, %c0_92] : memref<8x32xf32, #tpu.memory_space<vmem>>, vector<8x32xf32>
      tpu.vector_store %arg17[%c0_91, %c0_92], %203 {strides = array<i32>} : memref<8x32xf32, #tpu.memory_space<vmem>>, vector<8x32xf32>,
    } else {
    }
    %c0 = arith.constant 0 : index
    %c0_1 = arith.constant 0 : index
    %3 = vector.load %arg17[%c0, %c0_1] : memref<8x32xf32, #tpu.memory_space<vmem>>, vector<8x32xf32>
    %4 = arith.truncf %3 : vector<8x32xf32> to vector<8x32xbf16>
    %c0_2 = arith.constant 0 : index
    %c0_3 = arith.constant 0 : index
    %c0_4 = arith.constant 0 : index
    %5 = vector.load %arg3[%c0_2, %c0_3, %c0_4] : memref<1x1x8xf32, #tpu.memory_space<vmem>>, vector<1x1x8xf32>
    %6 = vector.shape_cast %5 : vector<1x1x8xf32> to vector<1x8xf32>
    %cst = arith.constant 0.000000e+00 : f32
    %7 = vector.broadcast %cst : f32 to vector<1x8xf32>
    %8 = arith.cmpf oeq, %6, %7 : vector<1x8xf32>
    %cst_5 = arith.constant -1.000000e+09 : f32
    %cst_6 = arith.constant 0.000000e+00 : f32
    %9 = vector.broadcast %cst_5 : f32 to vector<1x8xf32>
    %10 = vector.broadcast %cst_6 : f32 to vector<1x8xf32>
    %11 = arith.select %8, %9, %10 : vector<1x8xi1>, vector<1x8xf32>
    %c0_7 = arith.constant 0 : index
    %c0_8 = arith.constant 0 : index
    %c0_9 = arith.constant 0 : index
    %12 = vector.load %arg4[%c0_7, %c0_8, %c0_9] : memref<1x32x96xbf16, #tpu.memory_space<vmem>>, vector<1x32x96xbf16>
    %13 = vector.shape_cast %12 : vector<1x32x96xbf16> to vector<32x96xbf16>
    %cst_10 = arith.constant dense<0.000000e+00> : vector<8x96xf32>
    %14 = tpu.matmul %4, %13, %cst_10 {dimension_numbers = #tpu.dot_dimension_numbers<[1], [0], [0], [1], [0, 0, 1, 1], [], []>} : vector<8x32xbf16>, vector<32x96xbf16>, vector<8x96xf32> -> vector<8x96xf32>
    %c0_11 = arith.constant 0 : index
    %c0_12 = arith.constant 0 : index
    %c0_13 = arith.constant 0 : index
    %15 = vector.load %arg5[%c0_11, %c0_12, %c0_13] : memref<1x1x96xf32, #tpu.memory_space<vmem>>, vector<1x1x96xf32>
    %16 = vector.shape_cast %15 : vector<1x1x96xf32> to vector<1x96xf32>
    %17 = vector.broadcast %16 : vector<1x96xf32> to vector<8x96xf32>
    %18 = arith.addf %14, %17 : vector<8x96xf32>
    %19 = vector.extract_strided_slice %18 {offsets = [0, 0], sizes = [8, 8], strides = [1, 1]} : vector<8x96xf32> to vector<8x8xf32>
    %20 = arith.truncf %19 : vector<8x8xf32> to vector<8x8xbf16>
    %21 = vector.extract_strided_slice %18 {offsets = [0, 32], sizes = [8, 8], strides = [1, 1]} : vector<8x96xf32> to vector<8x8xf32>
    %22 = arith.truncf %21 : vector<8x8xf32> to vector<8x8xbf16>
    %23 = vector.extract_strided_slice %18 {offsets = [0, 64], sizes = [8, 8], strides = [1, 1]} : vector<8x96xf32> to vector<8x8xf32>
    %24 = arith.truncf %23 : vector<8x8xf32> to vector<8x8xbf16>
    %25 = tpu.transpose %22, [1, 0] : vector<8x8xbf16> -> vector<8x8xbf16>
    %cst_14 = arith.constant dense<0.000000e+00> : vector<8x8xf32>
    %26 = tpu.matmul %20, %25, %cst_14 {dimension_numbers = #tpu.dot_dimension_numbers<[1], [0], [0], [1], [0, 0, 1, 1], [], []>} : vector<8x8xbf16>, vector<8x8xbf16>, vector<8x8xf32> -> vector<8x8xf32>
    %cst_15 = arith.constant 0.353553385 : f32
    %27 = vector.broadcast %cst_15 : f32 to vector<8x8xf32>
    %28 = arith.mulf %26, %27 : vector<8x8xf32>
    %29 = vector.broadcast %11 : vector<1x8xf32> to vector<8x8xf32>
    %30 = arith.addf %28, %29 : vector<8x8xf32>
    %cst_16 = arith.constant dense<0xFF800000> : vector<8xf32>
    %31 = vector.multi_reduction <maximumf>, %30, %cst_16 [1] : vector<8x8xf32> to vector<8xf32>
    %32 = vector.shape_cast %31 : vector<8xf32> to vector<8x1xf32>
    %33 = vector.broadcast %32 : vector<8x1xf32> to vector<8x8xf32>
    %34 = arith.subf %30, %33 : vector<8x8xf32>
    %35 = math.exp %34 : vector<8x8xf32>
    %cst_17 = arith.constant dense<0.000000e+00> : vector<8xf32>
    %36 = vector.multi_reduction <add>, %35, %cst_17 [1] : vector<8x8xf32> to vector<8xf32>
    %37 = vector.shape_cast %36 : vector<8xf32> to vector<8x1xf32>
    %38 = tpu.reciprocal %37 {approx = true} : vector<8x1xf32> -> vector<8x1xf32>
    %39 = vector.broadcast %38 : vector<8x1xf32> to vector<8x8xf32>
    %40 = arith.mulf %35, %39 : vector<8x8xf32>
    %41 = arith.truncf %40 : vector<8x8xf32> to vector<8x8xbf16>
    %cst_18 = arith.constant dense<0.000000e+00> : vector<8x8xf32>
    %42 = tpu.matmul %41, %24, %cst_18 {dimension_numbers = #tpu.dot_dimension_numbers<[1], [0], [0], [1], [0, 0, 1, 1], [], []>} : vector<8x8xbf16>, vector<8x8xbf16>, vector<8x8xf32> -> vector<8x8xf32>
    %c0_19 = arith.constant 0 : index
    %c0_20 = arith.constant 0 : index
    %43 = vector.load %arg18[%c0_19, %c0_20] : memref<8x32xf32, #tpu.memory_space<vmem>>, vector<8x8xf32>
    tpu.vector_store %arg18[%c0_19, %c0_20], %42 {strides = array<i32>} : memref<8x32xf32, #tpu.memory_space<vmem>>, vector<8x8xf32>,
    %44 = vector.extract_strided_slice %18 {offsets = [0, 8], sizes = [8, 8], strides = [1, 1]} : vector<8x96xf32> to vector<8x8xf32>
    %45 = arith.truncf %44 : vector<8x8xf32> to vector<8x8xbf16>
    %46 = vector.extract_strided_slice %18 {offsets = [0, 40], sizes = [8, 8], strides = [1, 1]} : vector<8x96xf32> to vector<8x8xf32>
    %47 = arith.truncf %46 : vector<8x8xf32> to vector<8x8xbf16>
    %48 = vector.extract_strided_slice %18 {offsets = [0, 72], sizes = [8, 8], strides = [1, 1]} : vector<8x96xf32> to vector<8x8xf32>
    %49 = arith.truncf %48 : vector<8x8xf32> to vector<8x8xbf16>
    %50 = tpu.transpose %47, [1, 0] : vector<8x8xbf16> -> vector<8x8xbf16>
    %cst_21 = arith.constant dense<0.000000e+00> : vector<8x8xf32>
    %51 = tpu.matmul %45, %50, %cst_21 {dimension_numbers = #tpu.dot_dimension_numbers<[1], [0], [0], [1], [0, 0, 1, 1], [], []>} : vector<8x8xbf16>, vector<8x8xbf16>, vector<8x8xf32> -> vector<8x8xf32>
    %cst_22 = arith.constant 0.353553385 : f32
    %52 = vector.broadcast %cst_22 : f32 to vector<8x8xf32>
    %53 = arith.mulf %51, %52 : vector<8x8xf32>
    %54 = vector.broadcast %11 : vector<1x8xf32> to vector<8x8xf32>
    %55 = arith.addf %53, %54 : vector<8x8xf32>
    %cst_23 = arith.constant dense<0xFF800000> : vector<8xf32>
    %56 = vector.multi_reduction <maximumf>, %55, %cst_23 [1] : vector<8x8xf32> to vector<8xf32>
    %57 = vector.shape_cast %56 : vector<8xf32> to vector<8x1xf32>
    %58 = vector.broadcast %57 : vector<8x1xf32> to vector<8x8xf32>
    %59 = arith.subf %55, %58 : vector<8x8xf32>
    %60 = math.exp %59 : vector<8x8xf32>
    %cst_24 = arith.constant dense<0.000000e+00> : vector<8xf32>
    %61 = vector.multi_reduction <add>, %60, %cst_24 [1] : vector<8x8xf32> to vector<8xf32>
    %62 = vector.shape_cast %61 : vector<8xf32> to vector<8x1xf32>
    %63 = tpu.reciprocal %62 {approx = true} : vector<8x1xf32> -> vector<8x1xf32>
    %64 = vector.broadcast %63 : vector<8x1xf32> to vector<8x8xf32>
    %65 = arith.mulf %60, %64 : vector<8x8xf32>
    %66 = arith.truncf %65 : vector<8x8xf32> to vector<8x8xbf16>
    %cst_25 = arith.constant dense<0.000000e+00> : vector<8x8xf32>
    %67 = tpu.matmul %66, %49, %cst_25 {dimension_numbers = #tpu.dot_dimension_numbers<[1], [0], [0], [1], [0, 0, 1, 1], [], []>} : vector<8x8xbf16>, vector<8x8xbf16>, vector<8x8xf32> -> vector<8x8xf32>
    %c0_26 = arith.constant 0 : index
    %c8 = arith.constant 8 : index
    %68 = vector.load %arg18[%c0_26, %c8] : memref<8x32xf32, #tpu.memory_space<vmem>>, vector<8x8xf32>
    tpu.vector_store %arg18[%c0_26, %c8], %67 {strides = array<i32>} : memref<8x32xf32, #tpu.memory_space<vmem>>, vector<8x8xf32>,
    %69 = vector.extract_strided_slice %18 {offsets = [0, 16], sizes = [8, 8], strides = [1, 1]} : vector<8x96xf32> to vector<8x8xf32>
    %70 = arith.truncf %69 : vector<8x8xf32> to vector<8x8xbf16>
    %71 = vector.extract_strided_slice %18 {offsets = [0, 48], sizes = [8, 8], strides = [1, 1]} : vector<8x96xf32> to vector<8x8xf32>
    %72 = arith.truncf %71 : vector<8x8xf32> to vector<8x8xbf16>
    %73 = vector.extract_strided_slice %18 {offsets = [0, 80], sizes = [8, 8], strides = [1, 1]} : vector<8x96xf32> to vector<8x8xf32>
    %74 = arith.truncf %73 : vector<8x8xf32> to vector<8x8xbf16>
    %75 = tpu.transpose %72, [1, 0] : vector<8x8xbf16> -> vector<8x8xbf16>
    %cst_27 = arith.constant dense<0.000000e+00> : vector<8x8xf32>
    %76 = tpu.matmul %70, %75, %cst_27 {dimension_numbers = #tpu.dot_dimension_numbers<[1], [0], [0], [1], [0, 0, 1, 1], [], []>} : vector<8x8xbf16>, vector<8x8xbf16>, vector<8x8xf32> -> vector<8x8xf32>
    %cst_28 = arith.constant 0.353553385 : f32
    %77 = vector.broadcast %cst_28 : f32 to vector<8x8xf32>
    %78 = arith.mulf %76, %77 : vector<8x8xf32>
    %79 = vector.broadcast %11 : vector<1x8xf32> to vector<8x8xf32>
    %80 = arith.addf %78, %79 : vector<8x8xf32>
    %cst_29 = arith.constant dense<0xFF800000> : vector<8xf32>
    %81 = vector.multi_reduction <maximumf>, %80, %cst_29 [1] : vector<8x8xf32> to vector<8xf32>
    %82 = vector.shape_cast %81 : vector<8xf32> to vector<8x1xf32>
    %83 = vector.broadcast %82 : vector<8x1xf32> to vector<8x8xf32>
    %84 = arith.subf %80, %83 : vector<8x8xf32>
    %85 = math.exp %84 : vector<8x8xf32>
    %cst_30 = arith.constant dense<0.000000e+00> : vector<8xf32>
    %86 = vector.multi_reduction <add>, %85, %cst_30 [1] : vector<8x8xf32> to vector<8xf32>
    %87 = vector.shape_cast %86 : vector<8xf32> to vector<8x1xf32>
    %88 = tpu.reciprocal %87 {approx = true} : vector<8x1xf32> -> vector<8x1xf32>
    %89 = vector.broadcast %88 : vector<8x1xf32> to vector<8x8xf32>
    %90 = arith.mulf %85, %89 : vector<8x8xf32>
    %91 = arith.truncf %90 : vector<8x8xf32> to vector<8x8xbf16>
    %cst_31 = arith.constant dense<0.000000e+00> : vector<8x8xf32>
    %92 = tpu.matmul %91, %74, %cst_31 {dimension_numbers = #tpu.dot_dimension_numbers<[1], [0], [0], [1], [0, 0, 1, 1], [], []>} : vector<8x8xbf16>, vector<8x8xbf16>, vector<8x8xf32> -> vector<8x8xf32>
    %c0_32 = arith.constant 0 : index
    %c16 = arith.constant 16 : index
    %93 = vector.load %arg18[%c0_32, %c16] : memref<8x32xf32, #tpu.memory_space<vmem>>, vector<8x8xf32>
    tpu.vector_store %arg18[%c0_32, %c16], %92 {strides = array<i32>} : memref<8x32xf32, #tpu.memory_space<vmem>>, vector<8x8xf32>,
    %94 = vector.extract_strided_slice %18 {offsets = [0, 24], sizes = [8, 8], strides = [1, 1]} : vector<8x96xf32> to vector<8x8xf32>
    %95 = arith.truncf %94 : vector<8x8xf32> to vector<8x8xbf16>
    %96 = vector.extract_strided_slice %18 {offsets = [0, 56], sizes = [8, 8], strides = [1, 1]} : vector<8x96xf32> to vector<8x8xf32>
    %97 = arith.truncf %96 : vector<8x8xf32> to vector<8x8xbf16>
    %98 = vector.extract_strided_slice %18 {offsets = [0, 88], sizes = [8, 8], strides = [1, 1]} : vector<8x96xf32> to vector<8x8xf32>
    %99 = arith.truncf %98 : vector<8x8xf32> to vector<8x8xbf16>
    %100 = tpu.transpose %97, [1, 0] : vector<8x8xbf16> -> vector<8x8xbf16>
    %cst_33 = arith.constant dense<0.000000e+00> : vector<8x8xf32>
    %101 = tpu.matmul %95, %100, %cst_33 {dimension_numbers = #tpu.dot_dimension_numbers<[1], [0], [0], [1], [0, 0, 1, 1], [], []>} : vector<8x8xbf16>, vector<8x8xbf16>, vector<8x8xf32> -> vector<8x8xf32>
    %cst_34 = arith.constant 0.353553385 : f32
    %102 = vector.broadcast %cst_34 : f32 to vector<8x8xf32>
    %103 = arith.mulf %101, %102 : vector<8x8xf32>
    %104 = vector.broadcast %11 : vector<1x8xf32> to vector<8x8xf32>
    %105 = arith.addf %103, %104 : vector<8x8xf32>
    %cst_35 = arith.constant dense<0xFF800000> : vector<8xf32>
    %106 = vector.multi_reduction <maximumf>, %105, %cst_35 [1] : vector<8x8xf32> to vector<8xf32>
    %107 = vector.shape_cast %106 : vector<8xf32> to vector<8x1xf32>
    %108 = vector.broadcast %107 : vector<8x1xf32> to vector<8x8xf32>
    %109 = arith.subf %105, %108 : vector<8x8xf32>
    %110 = math.exp %109 : vector<8x8xf32>
    %cst_36 = arith.constant dense<0.000000e+00> : vector<8xf32>
    %111 = vector.multi_reduction <add>, %110, %cst_36 [1] : vector<8x8xf32> to vector<8xf32>
    %112 = vector.shape_cast %111 : vector<8xf32> to vector<8x1xf32>
    %113 = tpu.reciprocal %112 {approx = true} : vector<8x1xf32> -> vector<8x1xf32>
    %114 = vector.broadcast %113 : vector<8x1xf32> to vector<8x8xf32>
    %115 = arith.mulf %110, %114 : vector<8x8xf32>
    %116 = arith.truncf %115 : vector<8x8xf32> to vector<8x8xbf16>
    %cst_37 = arith.constant dense<0.000000e+00> : vector<8x8xf32>
    %117 = tpu.matmul %116, %99, %cst_37 {dimension_numbers = #tpu.dot_dimension_numbers<[1], [0], [0], [1], [0, 0, 1, 1], [], []>} : vector<8x8xbf16>, vector<8x8xbf16>, vector<8x8xf32> -> vector<8x8xf32>
    %c0_38 = arith.constant 0 : index
    %c24 = arith.constant 24 : index
    %118 = vector.load %arg18[%c0_38, %c24] : memref<8x32xf32, #tpu.memory_space<vmem>>, vector<8x8xf32>
    tpu.vector_store %arg18[%c0_38, %c24], %117 {strides = array<i32>} : memref<8x32xf32, #tpu.memory_space<vmem>>, vector<8x8xf32>,
    %c0_39 = arith.constant 0 : index
    %c0_40 = arith.constant 0 : index
    %119 = vector.load %arg18[%c0_39, %c0_40] : memref<8x32xf32, #tpu.memory_space<vmem>>, vector<8x32xf32>
    %120 = arith.truncf %119 : vector<8x32xf32> to vector<8x32xbf16>
    %c0_41 = arith.constant 0 : index
    %c0_42 = arith.constant 0 : index
    %c0_43 = arith.constant 0 : index
    %121 = vector.load %arg6[%c0_41, %c0_42, %c0_43] : memref<1x32x32xbf16, #tpu.memory_space<vmem>>, vector<1x32x32xbf16>
    %122 = vector.shape_cast %121 : vector<1x32x32xbf16> to vector<32x32xbf16>
    %cst_44 = arith.constant dense<0.000000e+00> : vector<8x32xf32>
    %123 = tpu.matmul %120, %122, %cst_44 {dimension_numbers = #tpu.dot_dimension_numbers<[1], [0], [0], [1], [0, 0, 1, 1], [], []>} : vector<8x32xbf16>, vector<32x32xbf16>, vector<8x32xf32> -> vector<8x32xf32>
    %c0_45 = arith.constant 0 : index
    %c0_46 = arith.constant 0 : index
    %c0_47 = arith.constant 0 : index
    %124 = vector.load %arg7[%c0_45, %c0_46, %c0_47] : memref<1x1x32xf32, #tpu.memory_space<vmem>>, vector<1x1x32xf32>
    %125 = vector.shape_cast %124 : vector<1x1x32xf32> to vector<1x32xf32>
    %126 = vector.broadcast %125 : vector<1x32xf32> to vector<8x32xf32>
    %127 = arith.addf %123, %126 : vector<8x32xf32>
    %128 = arith.addf %3, %127 : vector<8x32xf32>
    %c0_48 = arith.constant 0 : index
    %c0_49 = arith.constant 0 : index
    %c0_50 = arith.constant 0 : index
    %129 = vector.load %arg12[%c0_48, %c0_49, %c0_50] : memref<1x1x32xf32, #tpu.memory_space<vmem>>, vector<1x1x32xf32>
    %130 = vector.shape_cast %129 : vector<1x1x32xf32> to vector<1x32xf32>
    %c0_51 = arith.constant 0 : index
    %c0_52 = arith.constant 0 : index
    %c0_53 = arith.constant 0 : index
    %131 = vector.load %arg13[%c0_51, %c0_52, %c0_53] : memref<1x1x32xf32, #tpu.memory_space<vmem>>, vector<1x1x32xf32>
    %132 = vector.shape_cast %131 : vector<1x1x32xf32> to vector<1x32xf32>
    %cst_54 = arith.constant dense<0.000000e+00> : vector<8xf32>
    %133 = vector.multi_reduction <add>, %128, %cst_54 [1] : vector<8x32xf32> to vector<8xf32>
    %134 = vector.shape_cast %133 : vector<8xf32> to vector<8x1xf32>
    %cst_55 = arith.constant 3.200000e+01 : f32
    %135 = vector.broadcast %cst_55 : f32 to vector<8x1xf32>
    %136 = arith.divf %134, %135 : vector<8x1xf32>
    %137 = vector.broadcast %136 : vector<8x1xf32> to vector<8x32xf32>
    %138 = arith.subf %128, %137 : vector<8x32xf32>
    %139 = arith.mulf %138, %138 : vector<8x32xf32>
    %cst_56 = arith.constant dense<0.000000e+00> : vector<8xf32>
    %140 = vector.multi_reduction <add>, %139, %cst_56 [1] : vector<8x32xf32> to vector<8xf32>
    %141 = vector.shape_cast %140 : vector<8xf32> to vector<8x1xf32>
    %cst_57 = arith.constant 0.0322580636 : f32
    %142 = vector.broadcast %cst_57 : f32 to vector<8x1xf32>
    %143 = arith.mulf %141, %142 : vector<8x1xf32>
    %144 = math.sqrt %143 : vector<8x1xf32>
    %cst_58 = arith.constant 9.99999997E-7 : f32
    %145 = vector.broadcast %cst_58 : f32 to vector<8x1xf32>
    %146 = arith.addf %144, %145 : vector<8x1xf32>
    %147 = tpu.reciprocal %146 {approx = true} : vector<8x1xf32> -> vector<8x1xf32>
    %148 = vector.broadcast %147 : vector<8x1xf32> to vector<8x32xf32>
    %149 = arith.mulf %138, %148 : vector<8x32xf32>
    %150 = vector.broadcast %130 : vector<1x32xf32> to vector<8x32xf32>
    %151 = arith.mulf %150, %149 : vector<8x32xf32>
    %152 = vector.broadcast %132 : vector<1x32xf32> to vector<8x32xf32>
    %153 = arith.addf %151, %152 : vector<8x32xf32>
    %154 = arith.truncf %153 : vector<8x32xf32> to vector<8x32xbf16>
    %c0_59 = arith.constant 0 : index
    %c0_60 = arith.constant 0 : index
    %c0_61 = arith.constant 0 : index
    %155 = vector.load %arg8[%c0_59, %c0_60, %c0_61] : memref<1x32x64xbf16, #tpu.memory_space<vmem>>, vector<1x32x64xbf16>
    %156 = vector.shape_cast %155 : vector<1x32x64xbf16> to vector<32x64xbf16>
    %cst_62 = arith.constant dense<0.000000e+00> : vector<8x64xf32>
    %157 = tpu.matmul %154, %156, %cst_62 {dimension_numbers = #tpu.dot_dimension_numbers<[1], [0], [0], [1], [0, 0, 1, 1], [], []>} : vector<8x32xbf16>, vector<32x64xbf16>, vector<8x64xf32> -> vector<8x64xf32>
    %c0_63 = arith.constant 0 : index
    %c0_64 = arith.constant 0 : index
    %c0_65 = arith.constant 0 : index
    %158 = vector.load %arg9[%c0_63, %c0_64, %c0_65] : memref<1x1x64xf32, #tpu.memory_space<vmem>>, vector<1x1x64xf32>
    %159 = vector.shape_cast %158 : vector<1x1x64xf32> to vector<1x64xf32>
    %160 = vector.broadcast %159 : vector<1x64xf32> to vector<8x64xf32>
    %161 = arith.addf %157, %160 : vector<8x64xf32>
    %cst_66 = arith.constant 0.000000e+00 : f32
    %162 = vector.broadcast %cst_66 : f32 to vector<8x64xf32>
    %163 = arith.maximumf %161, %162 : vector<8x64xf32>
    %164 = arith.truncf %163 : vector<8x64xf32> to vector<8x64xbf16>
    %c0_67 = arith.constant 0 : index
    %c0_68 = arith.constant 0 : index
    %c0_69 = arith.constant 0 : index
    %165 = vector.load %arg10[%c0_67, %c0_68, %c0_69] : memref<1x64x32xbf16, #tpu.memory_space<vmem>>, vector<1x64x32xbf16>
    %166 = vector.shape_cast %165 : vector<1x64x32xbf16> to vector<64x32xbf16>
    %cst_70 = arith.constant dense<0.000000e+00> : vector<8x32xf32>
    %167 = tpu.matmul %164, %166, %cst_70 {dimension_numbers = #tpu.dot_dimension_numbers<[1], [0], [0], [1], [0, 0, 1, 1], [], []>} : vector<8x64xbf16>, vector<64x32xbf16>, vector<8x32xf32> -> vector<8x32xf32>
    %c0_71 = arith.constant 0 : index
    %c0_72 = arith.constant 0 : index
    %c0_73 = arith.constant 0 : index
    %168 = vector.load %arg11[%c0_71, %c0_72, %c0_73] : memref<1x1x32xf32, #tpu.memory_space<vmem>>, vector<1x1x32xf32>
    %169 = vector.shape_cast %168 : vector<1x1x32xf32> to vector<1x32xf32>
    %170 = vector.broadcast %169 : vector<1x32xf32> to vector<8x32xf32>
    %171 = arith.addf %167, %170 : vector<8x32xf32>
    %172 = arith.addf %153, %171 : vector<8x32xf32>
    %c0_74 = arith.constant 0 : index
    %c0_75 = arith.constant 0 : index
    %c0_76 = arith.constant 0 : index
    %173 = vector.load %arg14[%c0_74, %c0_75, %c0_76] : memref<1x1x32xf32, #tpu.memory_space<vmem>>, vector<1x1x32xf32>
    %174 = vector.shape_cast %173 : vector<1x1x32xf32> to vector<1x32xf32>
    %c0_77 = arith.constant 0 : index
    %c0_78 = arith.constant 0 : index
    %c0_79 = arith.constant 0 : index
    %175 = vector.load %arg15[%c0_77, %c0_78, %c0_79] : memref<1x1x32xf32, #tpu.memory_space<vmem>>, vector<1x1x32xf32>
    %176 = vector.shape_cast %175 : vector<1x1x32xf32> to vector<1x32xf32>
    %cst_80 = arith.constant dense<0.000000e+00> : vector<8xf32>
    %177 = vector.multi_reduction <add>, %172, %cst_80 [1] : vector<8x32xf32> to vector<8xf32>
    %178 = vector.shape_cast %177 : vector<8xf32> to vector<8x1xf32>
    %cst_81 = arith.constant 3.200000e+01 : f32
    %179 = vector.broadcast %cst_81 : f32 to vector<8x1xf32>
    %180 = arith.divf %178, %179 : vector<8x1xf32>
    %181 = vector.broadcast %180 : vector<8x1xf32> to vector<8x32xf32>
    %182 = arith.subf %172, %181 : vector<8x32xf32>
    %183 = arith.mulf %182, %182 : vector<8x32xf32>
    %cst_82 = arith.constant dense<0.000000e+00> : vector<8xf32>
    %184 = vector.multi_reduction <add>, %183, %cst_82 [1] : vector<8x32xf32> to vector<8xf32>
    %185 = vector.shape_cast %184 : vector<8xf32> to vector<8x1xf32>
    %cst_83 = arith.constant 0.0322580636 : f32
    %186 = vector.broadcast %cst_83 : f32 to vector<8x1xf32>
    %187 = arith.mulf %185, %186 : vector<8x1xf32>
    %188 = math.sqrt %187 : vector<8x1xf32>
    %cst_84 = arith.constant 9.99999997E-7 : f32
    %189 = vector.broadcast %cst_84 : f32 to vector<8x1xf32>
    %190 = arith.addf %188, %189 : vector<8x1xf32>
    %191 = tpu.reciprocal %190 {approx = true} : vector<8x1xf32> -> vector<8x1xf32>
    %192 = vector.broadcast %191 : vector<8x1xf32> to vector<8x32xf32>
    %193 = arith.mulf %182, %192 : vector<8x32xf32>
    %194 = vector.broadcast %174 : vector<1x32xf32> to vector<8x32xf32>
    %195 = arith.mulf %194, %193 : vector<8x32xf32>
    %196 = vector.broadcast %176 : vector<1x32xf32> to vector<8x32xf32>
    %197 = arith.addf %195, %196 : vector<8x32xf32>
    %c0_85 = arith.constant 0 : index
    %c0_86 = arith.constant 0 : index
    %198 = vector.load %arg17[%c0_85, %c0_86] : memref<8x32xf32, #tpu.memory_space<vmem>>, vector<8x32xf32>
    tpu.vector_store %arg17[%c0_85, %c0_86], %197 {strides = array<i32>} : memref<8x32xf32, #tpu.memory_space<vmem>>, vector<8x32xf32>,
    %c1_i32 = arith.constant 1 : i32
    %199 = arith.cmpi eq, %arg1, %c1_i32 : i32
    %200 = arith.extui %199 : i1 to i32
    %c0_i32_87 = arith.constant 0 : i32
    %201 = arith.cmpi ne, %200, %c0_i32_87 : i32
    scf.if %201 {
      %c0_88 = arith.constant 0 : index
      %c0_89 = arith.constant 0 : index
      %c0_90 = arith.constant 0 : index
      %202 = vector.load %arg16[%c0_88, %c0_89, %c0_90] : memref<1x8x32xf32, #tpu.memory_space<vmem>>, vector<1x8x32xf32>
      %203 = vector.shape_cast %202 : vector<1x8x32xf32> to vector<8x32xf32>
      %204 = vector.shape_cast %197 : vector<8x32xf32> to vector<1x8x32xf32>
      tpu.vector_store %arg16[%c0_88, %c0_89, %c0_90], %204 {strides = array<i32>} : memref<1x8x32xf32, #tpu.memory_space<vmem>>, vector<1x8x32xf32>,
    } else {
    }
    return
  }
  func.func @transform_0(%arg0: i32, %arg1: i32) -> (i32, i32, i32) {
    %c0_i32 = arith.constant 0 : i32
    %c0_i32_0 = arith.constant 0 : i32
    %c0_i32_1 = arith.constant 0 : i32
    return %arg0, %c0_i32, %c0_i32_0 : i32, i32, i32
  }
  func.func @transform_1(%arg0: i32, %arg1: i32) -> (i32, i32, i32) {
    %c0_i32 = arith.constant 0 : i32
    %c0_i32_0 = arith.constant 0 : i32
    %c0_i32_1 = arith.constant 0 : i32
    return %arg0, %c0_i32, %c0_i32_0 : i32, i32, i32
  }
  func.func @transform_2(%arg0: i32, %arg1: i32) -> (i32, i32, i32) {
    %c0_i32 = arith.constant 0 : i32
    %c0_i32_0 = arith.constant 0 : i32
    %c0_i32_1 = arith.constant 0 : i32
    return %arg1, %c0_i32, %c0_i32_0 : i32, i32, i32
  }
  func.func @transform_3(%arg0: i32, %arg1: i32) -> (i32, i32, i32) {
    %c0_i32 = arith.constant 0 : i32
    %c0_i32_0 = arith.constant 0 : i32
    %c0_i32_1 = arith.constant 0 : i32
    return %arg1, %c0_i32, %c0_i32_0 : i32, i32, i32
  }
  func.func @transform_4(%arg0: i32, %arg1: i32) -> (i32, i32, i32) {
    %c0_i32 = arith.constant 0 : i32
    %c0_i32_0 = arith.constant 0 : i32
    %c0_i32_1 = arith.constant 0 : i32
    return %arg1, %c0_i32, %c0_i32_0 : i32, i32, i32
  }
  func.func @transform_5(%arg0: i32, %arg1: i32) -> (i32, i32, i32) {
    %c0_i32 = arith.constant 0 : i32
    %c0_i32_0 = arith.constant 0 : i32
    %c0_i32_1 = arith.constant 0 : i32
    return %arg1, %c0_i32, %c0_i32_0 : i32, i32, i32
  }
  func.func @transform_6(%arg0: i32, %arg1: i32) -> (i32, i32, i32) {
    %c0_i32 = arith.constant 0 : i32
    %c0_i32_0 = arith.constant 0 : i32
    %c0_i32_1 = arith.constant 0 : i32
    return %arg1, %c0_i32, %c0_i32_0 : i32, i32, i32
  }
  func.func @transform_7(%arg0: i32, %arg1: i32) -> (i32, i32, i32) {
    %c0_i32 = arith.constant 0 : i32
    %c0_i32_0 = arith.constant 0 : i32
    %c0_i32_1 = arith.constant 0 : i32
    return %arg1, %c0_i32, %c0_i32_0 : i32, i32, i32
  }
  func.func @transform_8(%arg0: i32, %arg1: i32) -> (i32, i32, i32) {
    %c0_i32 = arith.constant 0 : i32
    %c0_i32_0 = arith.constant 0 : i32
    %c0_i32_1 = arith.constant 0 : i32
    return %arg1, %c0_i32, %c0_i32_0 : i32, i32, i32
  }
  func.func @transform_9(%arg0: i32, %arg1: i32) -> (i32, i32, i32) {
    %c0_i32 = arith.constant 0 : i32
    %c0_i32_0 = arith.constant 0 : i32
    %c0_i32_1 = arith.constant 0 : i32
    return %arg1, %c0_i32, %c0_i32_0 : i32, i32, i32
  }
  func.func @transform_10(%arg0: i32, %arg1: i32) -> (i32, i32, i32) {
    %c0_i32 = arith.constant 0 : i32
    %c0_i32_0 = arith.constant 0 : i32
    %c0_i32_1 = arith.constant 0 : i32
    return %arg1, %c0_i32, %c0_i32_0 : i32, i32, i32
  }
  func.func @transform_11(%arg0: i32, %arg1: i32) -> (i32, i32, i32) {
    %c0_i32 = arith.constant 0 : i32
    %c0_i32_0 = arith.constant 0 : i32
    %c0_i32_1 = arith.constant 0 : i32
    return %arg1, %c0_i32, %c0_i32_0 : i32, i32, i32
  }
  func.func @transform_12(%arg0: i32, %arg1: i32) -> (i32, i32, i32) {
    %c0_i32 = arith.constant 0 : i32
    %c0_i32_0 = arith.constant 0 : i32
    %c0_i32_1 = arith.constant 0 : i32
    return %arg1, %c0_i32, %c0_i32_0 : i32, i32, i32
  }
  func.func @transform_13(%arg0: i32, %arg1: i32) -> (i32, i32, i32) {
    %c0_i32 = arith.constant 0 : i32
    %c0_i32_0 = arith.constant 0 : i32
    %c0_i32_1 = arith.constant 0 : i32
    return %arg1, %c0_i32, %c0_i32_0 : i32, i32, i32
  }
  func.func @transform_14(%arg0: i32, %arg1: i32) -> (i32, i32, i32) {
    %c0_i32 = arith.constant 0 : i32
    %c0_i32_0 = arith.constant 0 : i32
    %c0_i32_1 = arith.constant 0 : i32
    return %arg0, %c0_i32, %c0_i32_0 : i32, i32, i32
  }
}

</mosaic_0001>

<bundles_post_ra>
// kernel: transformer_enc_model.1
= control target key start
LH: loop header
LB: loop body
LE: loop exit
PB: predicated region body
PF: predicated region fallthrough
CT: control target
= control target key end

     0   :  { %s4003_s0 = inlined_call_operand.hbm [shape: f32[2,8,32], index: 0, kind: input, shape index: {}]   ;;  %s4004_s1 = inlined_call_operand.hbm [shape: f32[2,1,8], index: 1, kind: input, shape index: {}]   ;;  %s4005_s2 = inlined_call_operand.hbm [shape: bf16[2,32,96], index: 2, kind: input, shape index: {}]   ;;  %s4006_s3 = inlined_call_operand.hbm [shape: f32[2,1,96], index: 3, kind: input, shape index: {}]   ;;  %s4007_s4 = inlined_call_operand.hbm [shape: bf16[2,32,32], index: 4, kind: input, shape index: {}]   ;;  %s4008_s5 = inlined_call_operand.hbm [shape: f32[2,1,32], index: 5, kind: input, shape index: {}]   ;;  %s4009_s6 = inlined_call_operand.hbm [shape: bf16[2,32,64], index: 6, kind: input, shape index: {}]   ;;  %s4010_s7 = inlined_call_operand.hbm [shape: f32[2,1,64], index: 7, kind: input, shape index: {}]   ;;  %s4011_s8 = inlined_call_operand.hbm [shape: bf16[2,64,32], index: 8, kind: input, shape index: {}]   ;;  %s4012_s9 = inlined_call_operand.hbm [shape: f32[2,1,32], index: 9, kind: input, shape index: {}]   ;;  %s4013_s10 = inlined_call_operand.hbm [shape: f32[2,1,32], index: 10, kind: input, shape index: {}]   ;;  %s4014_s11 = inlined_call_operand.hbm [shape: f32[2,1,32], index: 11, kind: input, shape index: {}]   ;;  %s4015_s12 = inlined_call_operand.hbm [shape: f32[2,1,32], index: 12, kind: input, shape index: {}]   ;;  %s4016_s13 = inlined_call_operand.hbm [shape: f32[2,1,32], index: 13, kind: input, shape index: {}]   ;;  %s4017_s14 = inlined_call_operand.hbm [shape: f32[2,8,32], index: 14, kind: output, shape index: {}]  }
   0x1   :  { %4045 = sst [smem:[#allocation51_spill]] %s4003_s0 }
   0x2   :  { %4046 = sst [smem:[#allocation52_spill]] %s4004_s1 }
   0x3   :  { %4047 = sst [smem:[#allocation53_spill]] %s4005_s2 }
   0x4   :  { %4048 = sst [smem:[#allocation54_spill]] %s4006_s3 }
   0x5   :  { %4049 = sst [smem:[#allocation55_spill]] %s4008_s5 }
   0x6   :  { %4050 = sst [smem:[#allocation56_spill]] %s4009_s6 }
   0x7   :  { %4051 = sst [smem:[#allocation57_spill]] %s4011_s8 }
   0x8   :  { %4052 = sst [smem:[#allocation58_spill]] %s4013_s10 }
   0x9   :  { %4053 = sst [smem:[#allocation59_spill]] %s4015_s12 }
   0xa   :  { %4054 = sst [smem:[#allocation60_spill]] %s4016_s13 }
   0xb   :  { %4055 = sst [smem:[#allocation61_spill]] %s4017_s14 }
   0xc   :  { %19 = vsyncpa [#allocation5], 0 }
   0xd   :  { %21 = vsyncpa [#allocation5 + $0x1], 0 }
   0xe   :  { %22 = vsyncpa [#allocation8], 0 }
   0xf   :  { %24 = vsyncpa [#allocation8 + $0x1], 0 }
  0x10   :  { %25 = vsyncpa [#allocation11], 0 }
  0x11   :  { %27 = vsyncpa [#allocation11 + $0x1], 0 }
  0x12   :  { %28 = vsyncpa [#allocation14], 0 }
  0x13   :  { %30 = vsyncpa [#allocation14 + $0x1], 0 }
  0x14   :  { %31 = vsyncpa [#allocation17], 0 }
  0x15   :  { %33 = vsyncpa [#allocation17 + $0x1], 0 }
  0x16   :  { %34 = vsyncpa [#allocation20], 0 }
  0x17   :  { %36 = vsyncpa [#allocation20 + $0x1], 0 }
  0x18   :  { %37 = vsyncpa [#allocation23], 0 }
  0x19   :  { %39 = vsyncpa [#allocation23 + $0x1], 0 }
  0x1a   :  { %40 = vsyncpa [#allocation26], 0 }
  0x1b   :  { %42 = vsyncpa [#allocation26 + $0x1], 0 }
  0x1c   :  { %43 = vsyncpa [#allocation6], 0 }
  0x1d   :  { %45 = vsyncpa [#allocation6 + $0x1], 0  ;;  %s3167_s29 = smov 0   ;;  %s3169_s30 = smov 0  }
  0x1e   :  { %s3171_s15 = smov 0   ;;  %s3173_s16 = smov 0  }
  0x1f   :  { %s3175_s17 = smov 0   ;;  %s3177_s18 = smov 0  }
  0x20   :  { %s3179_s19 = smov 0   ;;  %s3181_s20 = smov 0  }
  0x21   :  { %s3183_s21 = smov 0   ;;  %s3185_s22 = smov 0  }
  0x22   :  { %s3187_s23 = smov 0  }
  0x23 LB: > { %4056 = sst [smem:[#allocation38_spill]] %s3021_s30  ;;  %s3223_s24 = sadd.s32 4294967295, %s3057_s23   ;;  %s3057_s23 = sphi %s3187_s23, %s51_s23   ;;  %s3053_s22 = sphi %s3185_s22, %s4134_s22   ;;  %s3049_s21 = sphi %s3183_s21, %s4133_s21   ;;  %s3045_s20 = sphi %s3181_s20, %s4132_s20   ;;  %s3041_s19 = sphi %s3179_s19, %s4131_s19   ;;  %s3037_s18 = sphi %s3177_s18, %s4124_s18   ;;  %s3033_s17 = sphi %s3175_s17, %s4130_s17   ;;  %s3029_s16 = sphi %s3173_s16, %s4129_s16   ;;  %s3025_s15 = sphi %s3171_s15, %s4128_s15   ;;  %s3021_s30 = sphi %s3169_s30, %s4127_s30   ;;  %s3017_s29 = sphi %s3167_s29, %s4121_s29  }
  0x24   : > { %4057 = sst [smem:[#allocation39_spill]] %s3029_s16  ;;  %s2149_s25 = sadd.s32 4294967294, %s3057_s23  }
  0x25   : > { %4058 = sst [smem:[#allocation40_spill]] %s3037_s18  ;;  %s60_s26 = sadd.s32 1, %s3049_s21 }
  0x26   : > { %4059 = sst [smem:[#allocation41_spill]] %s3041_s19  ;;  %s63_s27 = sadd.s32 1, %s3053_s22 }
  0x27   : > { %4060 = sst [smem:[#allocation42_spill]] %s3045_s20  ;;  %p61_p0 = scmp.ge.s32.totalorder %s60_s26, 2 }
  0x28   : > { %4061 = sst [smem:[#allocation43_spill]] %s3223_s24  ;;  %s70_s28 = sadd.s32 1, %s3037_s18 }
  0x29   : > { %p77_p1 = scmp.ne.s32.totalorder %s3037_s18, %s3033_s17  ;;  %p78_p2 = scmp.eq.s32.totalorder %s3057_s23, 0 }
  0x2a   : > { %s4136_s26 = smov (%p61_p0, %s60_s26), 0  ;;  %s4138_s27 = smov (!%p61_p0, %s63_s27), %s3053_s22 }
  0x2b   : > { %4062 = sst [smem:[#allocation44_spill]] %s4136_s26  ;;  %p3240_p3 = por %p78_p2, %p77_p1 }
  0x2c   : > { %p4025_p4 = scmp.ne.s32.totalorder %s3033_s17, %s3029_s16  ;;  %p65_p5 = scmp.ge.s32.totalorder %s4138_s27, 2 }
  0x2d   : > { %s4063_s14 = scalar_select %p3240_p3, 1, 0 }
  0x2e   : > { %p84_p6 = scmp.eq.s32.totalorder %s3223_s24, 0  ;;  %s119_s20 = ssub.s32 %s3049_s21, %s4136_s26 }
  0x2f   : > { %s122_s19 = sadd.s32 1, %s3025_s15  ;;  %s4140_s27 = smov (%p65_p5, %s4138_s27), 0 }
  0x30   : > { %4064 = sst [smem:[#allocation45_spill]] %s4140_s27  ;;  %p3257_p7 = por %p84_p6, %p4025_p4 }
  0x31   : > { %p120_p8 = scmp.eq.s32.totalorder %s119_s20, 0  ;;  %s67_s12 = ssub.s32 %s3053_s22, %s4140_s27 }
  0x32   : > { %s4065_s13 = scalar_select %p3257_p7, 1, 0 }
  0x33   : > { %p129_p9 = scmp.ne.s32.totalorder %s3025_s15, %s3021_s30  ;;  %p68_p10 = scmp.eq.s32.totalorder %s67_s12, 0 }
  0x34   : > { %p135_p11 = scmp.ne.s32.totalorder %s3021_s30, %s3017_s29  ;;  %p445_p0 = scmp.eq.s32.totalorder %s3223_s24, 3 }
  0x35   : > { %s3268_s10 = scalar_select %p120_p8, %s3025_s15, %s122_s19  }
  0x36   : > { %s3271_s26 = scalar_select %p68_p10, %s3037_s18, %s70_s28  }
  0x37   : > { %4066 = sst [smem:[#allocation46_spill]] %s3268_s10  ;;  %p3275_p12 = por %p129_p9, %p78_p2 }
  0x38   : > { %4067 = sst [smem:[#allocation47_spill]] %s3271_s26  ;;  %p3281_p13 = por %p135_p11, %p84_p6 }
  0x39   : > { %s4068_s8 = scalar_select %p3275_p12, 1, 0 }
  0x3a   : > { %s4069_s6 = scalar_select %p3281_p13, 1, 0 }
  0x3b   : > { %p451_p5 = scmp.eq.s32.totalorder %s2149_s25, 3  ;;  %p3289_p4 = por %p445_p0, %p77_p1 }
  0x3c   : > { %4070 = sst [smem:[#allocation48_spill]] %s4069_s6  ;;  %p4073_p8 = scmp.ne.s32.totalorder %s3033_s17, %s3029_s16 }
  0x3d   : > { %s4071_s12 = scalar_select %p3289_p4, 1, 0 }
  0x3e   : > { %p3296_p10 = por %p451_p5, %p4073_p8  ;;  %p2151_p2 = scmp.ge.s32.totalorder %s3057_s23, 4 }
  0x3f   : > { %4072 = sst [smem:[#allocation49_spill]] %s4071_s12  ;;  %s3302_s19 = sand.u32 (!%p2151_p2), 1, %s3037_s18  }
  0x40   : > { %s4074_s29 = scalar_select %p3296_p10, 1, 0 }
  0x41   : > { %467 = sbr.rel (%p2151_p2) target bundleno = 437 (0x1b5), region = 16  ;;  %s3305_s20 = sand.u32 (!%p2151_p2), 1, %s3057_s23  }
  0x42   : > { %4075 = sst [smem:[#allocation50_spill]] %s4074_s29  ;;  %s2154_s25 = sshll.u32 (!%p2151_p2), %s3053_s22, 4 }
  0x43   : > { %s492_s28 = scalar_lea.vmem (!%p2151_p2), [#allocation7], %s3302_s19  ;;  %s4076_s1 = sld [smem:[#allocation52_spill]] (!%p2151_p2) }
  0x44   : > { %s499_s27 = sshll.u32 (!%p2151_p2), %s492_s28, 4  ;;  %s4040_s16 = scalar_lea.sflag (!%p2151_p2), [#allocation8], %s3305_s20  ;;  %s500_s27 = int_to_ptr.vmem [resolvable:$true] %s499_s27 }
  0x49   : > { %s3312_s29 = scalar_lea.hbm %s4076_s1, %s2154_s25  ;;  %s2515_s28 = scalar_lea.hbm %s4076_s1, 32 }
  0x4a   : > { %s2511_s18 = scalar_lea.hbm %s3312_s29, 16  ;;  %p2516_p11 = scmp.lt.u32.totalorder %s3312_s29, %s4076_s1 }
  0x4b   : > { %p2512_p1 = scmp.ne.s32.totalorder %s3312_s29, %s2511_s18  ;;  %p2517_p0 = scmp.lt.u32.totalorder %s2515_s28, %s2511_s18 }
  0x4c   : > { %p2519_p8 = scmp.lt.u32.totalorder %s2511_s18, %s3312_s29 }
  0x4d   : > { %p2513_p6 = pnand %p2512_p1, %p3240_p3  ;;  %p2518_p5 = por %p2517_p0, %p2516_p11 }
  0x4f   : > { %p2514_p9 = pneg %p2513_p6  ;;  %p2520_p2 = por %p2519_p8, %p2518_p5 }
  0x51   : > { %p2521_p10 = pnand %p2520_p2, %p2514_p9 }
  0x53   : > { %2524 = shalt.err (!%p2521_p10)
}
  0x54   : > { %s2525_s10 = scalar_lea.vmem %s500_s27, 16  ;;  %s3059_s26 = smov [#allocation7]  }
  0x55   : > { %p2526_p4 = scmp.ne.s32.totalorder %s500_s27, %s2525_s10  ;;  %s2529_s25 = sshll.u32 %s3059_s26, 4  ;;  %s2530_s25 = int_to_ptr.vmem [resolvable:$false] %s2529_s25 }
  0x56   : > { %s2531_s6 = scalar_lea.vmem %s2530_s25, 32  ;;  %p2532_p13 = scmp.lt.s32.totalorder %s500_s27, %s2530_s25 }
  0x57   : > { %p2527_p1 = pnand %p2526_p4, %p3240_p3  ;;  %p2533_p7 = scmp.lt.s32.totalorder %s2531_s6, %s2525_s10 }
  0x59   : > { %p2528_p6 = pneg %p2527_p1  ;;  %p2534_p12 = por %p2533_p7, %p2532_p13 }
  0x5b   : > { %p2535_p0 = pnand %p2534_p12, %p2528_p6 }
  0x5d   : > { %2538 = shalt.err (!%p2535_p0)
}
  0x5e   : > { %2337 = dma.hbm_to_vmem [thread:$0]  (%p3240_p3), %s3312_s29, 16, %s500_s27, %s4040_s16  }
  0x5f   : > { %s3335_s30 = sand.u32 1, %s3025_s15   ;;  %s3338_s18 = sshll.u32 %s3049_s21, 4 }
  0x60   : > { %s4077_s3 = sld [smem:[#allocation54_spill]]  ;;  %s530_s10 = scalar_lea.vmem [#allocation10], %s3335_s30 }
  0x61   : > { %s537_s26 = sshll.u32 %s530_s10, 4  ;;  %p4078_p7 = scmp.ne.s32.totalorder %s4068_s8, 0  ;;  %s538_s26 = int_to_ptr.vmem [resolvable:$true] %s537_s26 }
  0x66   : > { %s3344_s28 = scalar_lea.hbm %s4077_s3, %s3338_s18  ;;  %s2543_s16 = scalar_lea.hbm %s4077_s3, 32 }
  0x67   : > { %s2539_s27 = scalar_lea.hbm %s3344_s28, 16  ;;  %p2544_p10 = scmp.lt.u32.totalorder %s3344_s28, %s4077_s3 }
  0x68   : > { %p2540_p4 = scmp.ne.s32.totalorder %s3344_s28, %s2539_s27  ;;  %p2545_p9 = scmp.lt.u32.totalorder %s2543_s16, %s2539_s27 }
  0x69   : > { %p2547_p5 = scmp.lt.u32.totalorder %s2539_s27, %s3344_s28 }
  0x6a   : > { %p2541_p12 = pnand %p2540_p4, %p4078_p7  ;;  %p2546_p11 = por %p2545_p9, %p2544_p10 }
  0x6c   : > { %p2542_p13 = pneg %p2541_p12  ;;  %p2548_p8 = por %p2547_p5, %p2546_p11 }
  0x6e   : > { %p2549_p2 = pnand %p2548_p8, %p2542_p13 }
  0x70   : > { %2552 = shalt.err (!%p2549_p2)
}
  0x71   : > { %s2553_s10 = scalar_lea.vmem %s538_s26, 16  ;;  %s3060_s25 = smov [#allocation10]  }
  0x72   : > { %p2554_p1 = scmp.ne.s32.totalorder %s538_s26, %s2553_s10  ;;  %s2557_s1 = sshll.u32 %s3060_s25, 4  ;;  %s2558_s1 = int_to_ptr.vmem [resolvable:$false] %s2557_s1 }
  0x73   : > { %s2559_s29 = scalar_lea.vmem %s2558_s1, 32  ;;  %p2560_p4 = scmp.lt.s32.totalorder %s538_s26, %s2558_s1 }
  0x74   : > { %p2555_p6 = pnand %p2554_p1, %p4078_p7  ;;  %p2561_p12 = scmp.lt.s32.totalorder %s2559_s29, %s2553_s10 }
  0x76   : > { %p2556_p0 = pneg %p2555_p6  ;;  %p2562_p3 = por %p2561_p12, %p2560_p4 }
  0x78   : > { %p2563_p9 = pnand %p2562_p3, %p2556_p0 }
  0x7a   : > { %2566 = shalt.err (!%p2563_p9)
}
  0x7b   : > { %s4079_s16 = scalar_lea.sflag [#allocation11], %s3305_s20  ;;  %s4080_s5 = sld [smem:[#allocation55_spill]] }
  0x7c   : > { %2339 = dma.hbm_to_vmem [thread:$0]  (%p4078_p7), %s3344_s28, 16, %s538_s26, %s4079_s16  }
  0x7d   : > { %s568_s1 = scalar_lea.vmem [#allocation13], %s3335_s30 }
  0x7e   : > { %s575_s24 = sshll.u32 %s568_s1, 4  ;;  %s576_s24 = int_to_ptr.vmem [resolvable:$true] %s575_s24 }
  0x81   : > { %s3371_s25 = scalar_lea.hbm %s4080_s5, %s3338_s18  ;;  %s2571_s26 = scalar_lea.hbm %s4080_s5, 32 }
  0x82   : > { %s2567_s10 = scalar_lea.hbm %s3371_s25, 16  ;;  %p2572_p11 = scmp.lt.u32.totalorder %s3371_s25, %s4080_s5 }
  0x83   : > { %p2568_p3 = scmp.ne.s32.totalorder %s3371_s25, %s2567_s10  ;;  %p2573_p5 = scmp.lt.u32.totalorder %s2571_s26, %s2567_s10 }
  0x84   : > { %p2575_p2 = scmp.lt.u32.totalorder %s2567_s10, %s3371_s25 }
  0x85   : > { %p2569_p13 = pnand %p2568_p3, %p4078_p7  ;;  %p2574_p8 = por %p2573_p5, %p2572_p11 }
  0x87   : > { %p2570_p10 = pneg %p2569_p13  ;;  %p2576_p1 = por %p2575_p2, %p2574_p8 }
  0x89   : > { %p2577_p6 = pnand %p2576_p1, %p2570_p10 }
  0x8b   : > { %2580 = shalt.err (!%p2577_p6)
}
  0x8c   : > { %s2581_s6 = scalar_lea.vmem %s576_s24, 16  ;;  %s3061_s1 = smov [#allocation13]  }
  0x8d   : > { %p2582_p0 = scmp.ne.s32.totalorder %s576_s24, %s2581_s6  ;;  %s2585_s12 = sshll.u32 %s3061_s1, 4  ;;  %s2586_s12 = int_to_ptr.vmem [resolvable:$false] %s2585_s12 }
  0x8e   : > { %s2587_s29 = scalar_lea.vmem %s2586_s12, 32  ;;  %p2588_p9 = scmp.lt.s32.totalorder %s576_s24, %s2586_s12 }
  0x8f   : > { %p2583_p4 = pnand %p2582_p0, %p4078_p7  ;;  %p2589_p3 = scmp.lt.s32.totalorder %s2587_s29, %s2581_s6 }
  0x91   : > { %p2584_p12 = pneg %p2583_p4  ;;  %p2590_p13 = por %p2589_p3, %p2588_p9 }
  0x93   : > { %p2591_p5 = pnand %p2590_p13, %p2584_p12 }
  0x95   : > { %2594 = shalt.err (!%p2591_p5)
}
  0x96   : > { %s4081_s10 = scalar_lea.sflag [#allocation14], %s3305_s20  ;;  %s3398_s16 = scalar_lea.hbm %s4010_s7, %s3338_s18 }
  0x97   : > { %2341 = dma.hbm_to_vmem [thread:$0]  (%p4078_p7), %s3371_s25, 16, %s576_s24, %s4081_s10  }
  0x98   : > { %s606_s12 = scalar_lea.vmem [#allocation16], %s3335_s30  ;;  %s2595_s1 = scalar_lea.hbm %s3398_s16, 16 }
  0x99   : > { %s613_s27 = sshll.u32 %s606_s12, 4  ;;  %p2596_p10 = scmp.ne.s32.totalorder %s3398_s16, %s2595_s1  ;;  %s614_s27 = int_to_ptr.vmem [resolvable:$true] %s613_s27 }
  0x9a   : > { %s2599_s24 = scalar_lea.hbm %s4010_s7, 32  ;;  %p2600_p2 = scmp.lt.u32.totalorder %s3398_s16, %s4010_s7 }
  0x9b   : > { %p2597_p11 = pnand %p2596_p10, %p4078_p7  ;;  %p2601_p1 = scmp.lt.u32.totalorder %s2599_s24, %s2595_s1 }
  0x9c   : > { %p2603_p0 = scmp.lt.u32.totalorder %s2595_s1, %s3398_s16 }
  0x9d   : > { %p2598_p8 = pneg %p2597_p11  ;;  %p2602_p6 = por %p2601_p1, %p2600_p2 }
  0x9f   : > { %p2604_p4 = por %p2603_p0, %p2602_p6 }
  0xa1   : > { %p2605_p12 = pnand %p2604_p4, %p2598_p8 }
  0xa3   : > { %2608 = shalt.err (!%p2605_p12)
}
  0xa4   : > { %s2609_s26 = scalar_lea.vmem %s614_s27, 16  ;;  %s3062_s12 = smov [#allocation16]  }
  0xa5   : > { %p2610_p9 = scmp.ne.s32.totalorder %s614_s27, %s2609_s26  ;;  %s2613_s6 = sshll.u32 %s3062_s12, 4  ;;  %s2614_s6 = int_to_ptr.vmem [resolvable:$false] %s2613_s6 }
  0xa6   : > { %s2615_s29 = scalar_lea.vmem %s2614_s6, 32  ;;  %p2616_p5 = scmp.lt.s32.totalorder %s614_s27, %s2614_s6 }
  0xa7   : > { %p2611_p3 = pnand %p2610_p9, %p4078_p7  ;;  %p2617_p10 = scmp.lt.s32.totalorder %s2615_s29, %s2609_s26 }
  0xa9   : > { %p2612_p13 = pneg %p2611_p3  ;;  %p2618_p11 = por %p2617_p10, %p2616_p5 }
  0xab   : > { %p2619_p1 = pnand %p2618_p11, %p2612_p13 }
  0xad   : > { %2622 = shalt.err (!%p2619_p1)
}
  0xae   : > { %s4082_s1 = scalar_lea.sflag [#allocation17], %s3305_s20  ;;  %s3425_s10 = scalar_lea.hbm %s4012_s9, %s3338_s18 }
  0xaf   : > { %2343 = dma.hbm_to_vmem [thread:$0]  (%p4078_p7), %s3398_s16, 16, %s614_s27, %s4082_s1  }
  0xb0   : > { %s644_s6 = scalar_lea.vmem [#allocation19], %s3335_s30  ;;  %s2623_s12 = scalar_lea.hbm %s3425_s10, 16 }
  0xb1   : > { %s651_s28 = sshll.u32 %s644_s6, 4  ;;  %p2624_p8 = scmp.ne.s32.totalorder %s3425_s10, %s2623_s12  ;;  %s652_s28 = int_to_ptr.vmem [resolvable:$true] %s651_s28 }
  0xb2   : > { %s2627_s27 = scalar_lea.hbm %s4012_s9, 32  ;;  %p2628_p0 = scmp.lt.u32.totalorder %s3425_s10, %s4012_s9 }
  0xb3   : > { %p2625_p2 = pnand %p2624_p8, %p4078_p7  ;;  %p2629_p4 = scmp.lt.u32.totalorder %s2627_s27, %s2623_s12 }
  0xb4   : > { %p2631_p9 = scmp.lt.u32.totalorder %s2623_s12, %s3425_s10 }
  0xb5   : > { %p2626_p6 = pneg %p2625_p2  ;;  %p2630_p12 = por %p2629_p4, %p2628_p0 }
  0xb7   : > { %p2632_p3 = por %p2631_p9, %p2630_p12 }
  0xb9   : > { %p2633_p13 = pnand %p2632_p3, %p2626_p6 }
  0xbb   : > { %2636 = shalt.err (!%p2633_p13)
}
  0xbc   : > { %s2637_s24 = scalar_lea.vmem %s652_s28, 16  ;;  %s3063_s6 = smov [#allocation19]  }
  0xbd   : > { %p2638_p5 = scmp.ne.s32.totalorder %s652_s28, %s2637_s24  ;;  %s2641_s26 = sshll.u32 %s3063_s6, 4  ;;  %s2642_s26 = int_to_ptr.vmem [resolvable:$false] %s2641_s26 }
  0xbe   : > { %s2643_s29 = scalar_lea.vmem %s2642_s26, 32  ;;  %p2644_p1 = scmp.lt.s32.totalorder %s652_s28, %s2642_s26 }
  0xbf   : > { %p2639_p10 = pnand %p2638_p5, %p4078_p7  ;;  %p2645_p8 = scmp.lt.s32.totalorder %s2643_s29, %s2637_s24 }
  0xc1   : > { %p2640_p11 = pneg %p2639_p10  ;;  %p2646_p2 = por %p2645_p8, %p2644_p1 }
  0xc3   : > { %p2647_p0 = pnand %p2646_p2, %p2640_p11 }
  0xc5   : > { %2650 = shalt.err (!%p2647_p0)
}
  0xc6   : > { %s4083_s12 = scalar_lea.sflag [#allocation20], %s3305_s20  ;;  %s3452_s1 = scalar_lea.hbm %s4014_s11, %s3338_s18 }
  0xc7   : > { %2345 = dma.hbm_to_vmem [thread:$0]  (%p4078_p7), %s3425_s10, 16, %s652_s28, %s4083_s12  }
  0xc8   : > { %s678_s26 = scalar_lea.vmem [#allocation22], %s3335_s30  ;;  %s2651_s6 = scalar_lea.hbm %s3452_s1, 16 }
  0xc9   : > { %s685_s25 = sshll.u32 %s678_s26, 4  ;;  %p2652_p6 = scmp.ne.s32.totalorder %s3452_s1, %s2651_s6  ;;  %s686_s25 = int_to_ptr.vmem [resolvable:$true] %s685_s25 }
  0xca   : > { %s2655_s28 = scalar_lea.hbm %s4014_s11, 32  ;;  %p2656_p9 = scmp.lt.u32.totalorder %s3452_s1, %s4014_s11 }
  0xcb   : > { %p2653_p4 = pnand %p2652_p6, %p4078_p7  ;;  %p2657_p3 = scmp.lt.u32.totalorder %s2655_s28, %s2651_s6 }
  0xcc   : > { %p2659_p5 = scmp.lt.u32.totalorder %s2651_s6, %s3452_s1 }
  0xcd   : > { %p2654_p12 = pneg %p2653_p4  ;;  %p2658_p13 = por %p2657_p3, %p2656_p9 }
  0xcf   : > { %p2660_p10 = por %p2659_p5, %p2658_p13 }
  0xd1   : > { %p2661_p11 = pnand %p2660_p10, %p2654_p12 }
  0xd3   : > { %2664 = shalt.err (!%p2661_p11)
}
  0xd4   : > { %s2665_s27 = scalar_lea.vmem %s686_s25, 16  ;;  %s3064_s26 = smov [#allocation22]  }
  0xd5   : > { %p2666_p1 = scmp.ne.s32.totalorder %s686_s25, %s2665_s27  ;;  %s2669_s24 = sshll.u32 %s3064_s26, 4  ;;  %s2670_s24 = int_to_ptr.vmem [resolvable:$false] %s2669_s24 }
  0xd6   : > { %s2671_s29 = scalar_lea.vmem %s2670_s24, 32  ;;  %p2672_p0 = scmp.lt.s32.totalorder %s686_s25, %s2670_s24 }
  0xd7   : > { %p2667_p8 = pnand %p2666_p1, %p4078_p7  ;;  %p2673_p6 = scmp.lt.s32.totalorder %s2671_s29, %s2665_s27 }
  0xd9   : > { %p2668_p2 = pneg %p2667_p8  ;;  %p2674_p4 = por %p2673_p6, %p2672_p0 }
  0xdb   : > { %p2675_p3 = pnand %p2674_p4, %p2668_p2 }
  0xdd   : > { %2678 = shalt.err (!%p2675_p3)
}
  0xde   : > { %s4084_s6 = scalar_lea.sflag [#allocation23], %s3305_s20  ;;  %s2152_s10 = sshll.u32 %s3302_s19, 3 }
  0xdf   : > { %2347 = dma.hbm_to_vmem [thread:$0]  (%p4078_p7), %s3452_s1, 16, %s686_s25, %s4084_s6  }
  0xe0   : > { %s2153_s28 = sshll.u32 %s3053_s22, 7  ;;  %s4085_s0 = sld [smem:[#allocation51_spill]] }
  0xe1   : > { %s475_s27 = scalar_lea.vmem [#allocation4], %s2152_s10  ;;  %s3483_s29 = sshll.u32 %s3335_s30, 4 }
  0xe2   : > { %s482_s26 = sshll.u32 %s475_s27, 4  ;;  %s472_s3 = scalar_lea.sflag [#allocation5], %s3302_s19  ;;  %s483_s26 = int_to_ptr.vmem [resolvable:$true] %s482_s26 }
  0xe3   : > { %p4086_p9 = scmp.ne.s32.totalorder %s4063_s14, 0 }
  0xe6   : > { %s3480_s24 = scalar_lea.hbm %s4085_s0, %s2153_s28  ;;  %s2683_s6 = scalar_lea.hbm %s4085_s0, 256 }
  0xe7   : > { %s2679_s5 = scalar_lea.hbm %s3480_s24, 128  ;;  %p2684_p10 = scmp.lt.u32.totalorder %s3480_s24, %s4085_s0 }
  0xe8   : > { %p2680_p12 = scmp.ne.s32.totalorder %s3480_s24, %s2679_s5  ;;  %p2685_p11 = scmp.lt.u32.totalorder %s2683_s6, %s2679_s5 }
  0xe9   : > { %p2687_p8 = scmp.lt.u32.totalorder %s2679_s5, %s3480_s24 }
  0xea   : > { %p2681_p13 = pnand %p2680_p12, %p4086_p9  ;;  %p2686_p1 = por %p2685_p11, %p2684_p10 }
  0xec   : > { %p2682_p5 = pneg %p2681_p13  ;;  %p2688_p2 = por %p2687_p8, %p2686_p1 }
  0xee   : > { %p2689_p0 = pnand %p2688_p2, %p2682_p5 }
  0xf0   : > { %2692 = shalt.err (!%p2689_p0)
}
  0xf1   : > { %s2693_s19 = scalar_lea.vmem %s483_s26, 128  ;;  %s3065_s10 = smov [#allocation4]  }
  0xf2   : > { %p2694_p6 = scmp.ne.s32.totalorder %s483_s26, %s2693_s19  ;;  %s2697_s16 = sshll.u32 %s3065_s10, 4  ;;  %s2698_s16 = int_to_ptr.vmem [resolvable:$false] %s2697_s16 }
  0xf3   : > { %s2699_s27 = scalar_lea.vmem %s2698_s16, 256  ;;  %p2700_p12 = scmp.lt.s32.totalorder %s483_s26, %s2698_s16 }
  0xf4   : > { %p2695_p4 = pnand %p2694_p6, %p4086_p9  ;;  %p2701_p13 = scmp.lt.s32.totalorder %s2699_s27, %s2693_s19 }
  0xf6   : > { %p2696_p3 = pneg %p2695_p4  ;;  %p2702_p7 = por %p2701_p13, %p2700_p12 }
  0xf8   : > { %p2703_p10 = pnand %p2702_p7, %p2696_p3 }
  0xfa   : > { %2706 = shalt.err (!%p2703_p10)
}
  0xfb   : > { %2336 = dma.hbm_to_vmem [thread:$0]  (%p4086_p9), %s3480_s24, 128, %s483_s26, %s472_s3  }
  0xfc   : > { %s3504_s5 = sshll.u32 %s3049_s21, 8  ;;  %s510_s1 = scalar_lea.vmem [#allocation9], %s3483_s29 }
  0xfd   : > { %s517_s25 = sshll.u32 %s510_s1, 4  ;;  %s4087_s2 = sld [smem:[#allocation53_spill]]  ;;  %s3513_s25 = int_to_ptr.vmem [resolvable:$true] %s517_s25 }
  0xfe   : > { %p4088_p5 = scmp.ne.s32.totalorder %s4068_s8, 0 }
 0x103   : > { %s3511_s12 = scalar_lea.hbm %s4087_s2, %s3504_s5  ;;  %s2711_s26 = scalar_lea.hbm %s4087_s2, 512 }
 0x104   : > { %s2707_s14 = scalar_lea.hbm %s3511_s12, 256  ;;  %p2712_p1 = scmp.lt.u32.totalorder %s3511_s12, %s4087_s2 }
 0x105   : > { %p2708_p7 = scmp.ne.s32.totalorder %s3511_s12, %s2707_s14  ;;  %p2713_p8 = scmp.lt.u32.totalorder %s2711_s26, %s2707_s14 }
 0x106   : > { %p2715_p0 = scmp.lt.u32.totalorder %s2707_s14, %s3511_s12 }
 0x107   : > { %p2709_p9 = pnand %p2708_p7, %p4088_p5  ;;  %p2714_p2 = por %p2713_p8, %p2712_p1 }
 0x109   : > { %p2710_p11 = pneg %p2709_p9  ;;  %p2716_p6 = por %p2715_p0, %p2714_p2 }
 0x10b   : > { %p2717_p4 = pnand %p2716_p6, %p2710_p11 }
 0x10d   : > { %2720 = shalt.err (!%p2717_p4)
}
 0x10e   : > { %s2721_s16 = scalar_lea.vmem %s3513_s25, 256  ;;  %s3066_s27 = smov [#allocation9]  }
 0x10f   : > { %p2722_p3 = scmp.ne.s32.totalorder %s3513_s25, %s2721_s16  ;;  %s2725_s1 = sshll.u32 %s3066_s27, 4  ;;  %s2726_s1 = int_to_ptr.vmem [resolvable:$false] %s2725_s1 }
 0x110   : > { %s2727_s6 = scalar_lea.vmem %s2726_s1, 512  ;;  %p2728_p10 = scmp.lt.s32.totalorder %s3513_s25, %s2726_s1 }
 0x111   : > { %p2723_p12 = pnand %p2722_p3, %p4088_p5  ;;  %p2729_p7 = scmp.lt.s32.totalorder %s2727_s6, %s2721_s16 }
 0x113   : > { %p2724_p13 = pneg %p2723_p12  ;;  %p2730_p9 = por %p2729_p7, %p2728_p10 }
 0x115   : > { %p2731_p1 = pnand %p2730_p9, %p2724_p13 }
 0x117   : > { %2734 = shalt.err (!%p2731_p1)
}
 0x118   : > { %s3067_s28 = smov 64   ;;  %s3068_s14 = smov 4  }
 0x119   : > { %s4089_s3 = scalar_lea.sflag [#allocation8], %s3305_s20  ;;  %s3545_s19 = scalar_lea.hbm %s4007_s4, %s3504_s5 }
 0x11a   : > { %2338 = dma.hbm_to_vmem [thread:$0]  (%p4088_p5), %s3511_s12, 256, %s3513_s25, %s4089_s3, %s3067_s28, %s3067_s28, %s3068_s14  }
 0x11b   : > { %s548_s10 = scalar_lea.vmem [#allocation12], %s3483_s29  ;;  %s4090_s6 = sld [smem:[#allocation56_spill]] }
 0x11c   : > { %s555_s16 = sshll.u32 %s548_s10, 4  ;;  %s2735_s2 = scalar_lea.hbm %s3545_s19, 256  ;;  %s3548_s16 = int_to_ptr.vmem [resolvable:$true] %s555_s16 }
 0x11d   : > { %p2736_p11 = scmp.ne.s32.totalorder %s3545_s19, %s2735_s2  ;;  %s2739_s3 = scalar_lea.hbm %s4007_s4, 512 }
 0x11e   : > { %p2740_p0 = scmp.lt.u32.totalorder %s3545_s19, %s4007_s4  ;;  %p2741_p6 = scmp.lt.u32.totalorder %s2739_s3, %s2735_s2 }
 0x11f   : > { %p2737_p8 = pnand %p2736_p11, %p4088_p5  ;;  %p2743_p3 = scmp.lt.u32.totalorder %s2735_s2, %s3545_s19 }
 0x120   : > { %p2742_p4 = por %p2741_p6, %p2740_p0 }
 0x121   : > { %s3554_s0 = scalar_lea.hbm %s4090_s6, %s3504_s5  ;;  %p2738_p2 = pneg %p2737_p8 }
 0x122   : > { %p2744_p12 = por %p2743_p3, %p2742_p4 }
 0x124   : > { %p2745_p13 = pnand %p2744_p12, %p2738_p2 }
 0x126   : > { %2748 = shalt.err (!%p2745_p13)
}
 0x127   : > { %s2749_s5 = scalar_lea.vmem %s3548_s16, 256  ;;  %s3069_s10 = smov [#allocation12]  }
 0x128   : > { %p2750_p10 = scmp.ne.s32.totalorder %s3548_s16, %s2749_s5  ;;  %s2753_s27 = sshll.u32 %s3069_s10, 4  ;;  %s2754_s27 = int_to_ptr.vmem [resolvable:$false] %s2753_s27 }
 0x129   : > { %s2755_s1 = scalar_lea.vmem %s2754_s27, 512  ;;  %p2756_p1 = scmp.lt.s32.totalorder %s3548_s16, %s2754_s27 }
 0x12a   : > { %p2751_p7 = pnand %p2750_p10, %p4088_p5  ;;  %p2757_p11 = scmp.lt.s32.totalorder %s2755_s1, %s2749_s5 }
 0x12c   : > { %p2752_p9 = pneg %p2751_p7  ;;  %p2758_p8 = por %p2757_p11, %p2756_p1 }
 0x12e   : > { %p2759_p0 = pnand %p2758_p8, %p2752_p9 }
 0x130   : > { %2762 = shalt.err (!%p2759_p0)
}
 0x131   : > { %s4091_s2 = scalar_lea.sflag [#allocation11], %s3305_s20  ;;  %s586_s25 = scalar_lea.vmem [#allocation15], %s3483_s29 }
 0x132   : > { %2340 = dma.hbm_to_vmem [thread:$0]  (%p4088_p5), %s3545_s19, 256, %s3548_s16, %s4091_s2, %s3067_s28, %s3067_s28, %s3068_s14  }
 0x133   : > { %s593_s12 = sshll.u32 %s586_s25, 4  ;;  %s2167_s3 = sshll.u32 %s3335_s30, 5  ;;  %s3584_s12 = int_to_ptr.vmem [resolvable:$true] %s593_s12 }
 0x134   : > { %s2763_s24 = scalar_lea.hbm %s3554_s0, 256  ;;  %s2767_s10 = scalar_lea.hbm %s4090_s6, 512 }
 0x135   : > { %p2764_p2 = scmp.ne.s32.totalorder %s3554_s0, %s2763_s24  ;;  %p2768_p3 = scmp.lt.u32.totalorder %s3554_s0, %s4090_s6 }
 0x136   : > { %p2769_p12 = scmp.lt.u32.totalorder %s2767_s10, %s2763_s24  ;;  %p2771_p10 = scmp.lt.u32.totalorder %s2763_s24, %s3554_s0 }
 0x137   : > { %p2765_p6 = pnand %p2764_p2, %p4088_p5 }
 0x138   : > { %p2770_p13 = por %p2769_p12, %p2768_p3 }
 0x139   : > { %p2766_p4 = pneg %p2765_p6 }
 0x13a   : > { %p2772_p7 = por %p2771_p10, %p2770_p13 }
 0x13c   : > { %p2773_p9 = pnand %p2772_p7, %p2766_p4 }
 0x13e   : > { %2776 = shalt.err (!%p2773_p9)
}
 0x13f   : > { %s2777_s29 = scalar_lea.vmem %s3584_s12, 256  ;;  %s3070_s19 = smov [#allocation15]  }
 0x140   : > { %p2778_p1 = scmp.ne.s32.totalorder %s3584_s12, %s2777_s29  ;;  %s2781_s16 = sshll.u32 %s3070_s19, 4  ;;  %s2782_s16 = int_to_ptr.vmem [resolvable:$false] %s2781_s16 }
 0x141   : > { %s2783_s2 = scalar_lea.vmem %s2782_s16, 512  ;;  %p2784_p0 = scmp.lt.s32.totalorder %s3584_s12, %s2782_s16 }
 0x142   : > { %p2779_p11 = pnand %p2778_p1, %p4088_p5  ;;  %p2785_p2 = scmp.lt.s32.totalorder %s2783_s2, %s2777_s29 }
 0x144   : > { %p2780_p8 = pneg %p2779_p11  ;;  %p2786_p6 = por %p2785_p2, %p2784_p0 }
 0x146   : > { %p2787_p3 = pnand %p2786_p6, %p2780_p8 }
 0x148   : > { %2790 = shalt.err (!%p2787_p3)
}
 0x149   : > { %s4092_s25 = scalar_lea.sflag [#allocation14], %s3305_s20  ;;  %s2221_s24 = sshll.u32 %s3049_s21, 9 }
 0x14a   : > { %2342 = dma.hbm_to_vmem [thread:$0]  (%p4088_p5), %s3554_s0, 256, %s3584_s12, %s4092_s25, %s3067_s28, %s3067_s28, %s3068_s14  }
 0x14b   : > { %s624_s26 = scalar_lea.vmem [#allocation18], %s2167_s3  ;;  %s4093_s1 = sld [smem:[#allocation57_spill]] }
 0x14c   : > { %s631_s5 = sshll.u32 %s624_s26, 4  ;;  %s3620_s5 = int_to_ptr.vmem [resolvable:$true] %s631_s5 }
 0x151   : > { %s3618_s29 = scalar_lea.hbm %s4093_s1, %s2221_s24  ;;  %s2795_s3 = scalar_lea.hbm %s4093_s1, 1024 }
 0x152   : > { %s2791_s19 = scalar_lea.hbm %s3618_s29, 512  ;;  %p2796_p10 = scmp.lt.u32.totalorder %s3618_s29, %s4093_s1 }
 0x153   : > { %p2792_p4 = scmp.ne.s32.totalorder %s3618_s29, %s2791_s19  ;;  %p2797_p7 = scmp.lt.u32.totalorder %s2795_s3, %s2791_s19 }
 0x154   : > { %p2799_p1 = scmp.lt.u32.totalorder %s2791_s19, %s3618_s29 }
 0x155   : > { %p2793_p12 = pnand %p2792_p4, %p4088_p5  ;;  %p2798_p9 = por %p2797_p7, %p2796_p10 }
 0x157   : > { %p2794_p13 = pneg %p2793_p12  ;;  %p2800_p11 = por %p2799_p1, %p2798_p9 }
 0x159   : > { %p2801_p8 = pnand %p2800_p11, %p2794_p13 }
 0x15b   : > { %2804 = shalt.err (!%p2801_p8)
}
 0x15c   : > { %s2805_s25 = scalar_lea.vmem %s3620_s5, 512  ;;  %s3071_s24 = smov [#allocation18]  }
 0x15d   : > { %p2806_p0 = scmp.ne.s32.totalorder %s3620_s5, %s2805_s25  ;;  %s2809_s26 = sshll.u32 %s3071_s24, 4  ;;  %s2810_s26 = int_to_ptr.vmem [resolvable:$false] %s2809_s26 }
 0x15e   : > { %s2811_s10 = scalar_lea.vmem %s2810_s26, 1024  ;;  %p2812_p3 = scmp.lt.s32.totalorder %s3620_s5, %s2810_s26 }
 0x15f   : > { %p2807_p2 = pnand %p2806_p0, %p4088_p5  ;;  %p2813_p4 = scmp.lt.s32.totalorder %s2811_s10, %s2805_s25 }
 0x161   : > { %p2808_p6 = pneg %p2807_p2  ;;  %p2814_p12 = por %p2813_p4, %p2812_p3 }
 0x163   : > { %p2815_p10 = pnand %p2814_p12, %p2808_p6 }
 0x165   : > { %2818 = shalt.err (!%p2815_p10)
}
 0x166   : > { %s4094_s27 = scalar_lea.sflag [#allocation17], %s3305_s20  ;;  %s4095_s12 = sld [smem:[#allocation58_spill]] }
 0x167   : > { %2344 = dma.hbm_to_vmem [thread:$0]  (%p4088_p5), %s3618_s29, 512, %s3620_s5, %s4094_s27, %s3067_s28, %s3067_s28, %s3068_s14  }
 0x168   : > { %s661_s16 = scalar_lea.vmem [#allocation21], %s3335_s30  ;;  %s4096_s26 = sld [smem:[#allocation59_spill]] }
 0x169   : > { %s668_s2 = sshll.u32 %s661_s16, 4  ;;  %s669_s2 = int_to_ptr.vmem [resolvable:$true] %s668_s2 }
 0x16c   : > { %s3652_s3 = scalar_lea.hbm %s4095_s12, %s3338_s18  ;;  %s2823_s5 = scalar_lea.hbm %s4095_s12, 32 }
 0x16d   : > { %s2819_s1 = scalar_lea.hbm %s3652_s3, 16  ;;  %p2824_p1 = scmp.lt.u32.totalorder %s3652_s3, %s4095_s12 }
 0x16e   : > { %s3659_s10 = scalar_lea.hbm %s4096_s26, %s3338_s18  ;;  %p2820_p13 = scmp.ne.s32.totalorder %s3652_s3, %s2819_s1 }
 0x16f   : > { %p2825_p11 = scmp.lt.u32.totalorder %s2823_s5, %s2819_s1  ;;  %p2827_p0 = scmp.lt.u32.totalorder %s2819_s1, %s3652_s3 }
 0x170   : > { %p2821_p7 = pnand %p2820_p13, %p4088_p5 }
 0x171   : > { %p2826_p8 = por %p2825_p11, %p2824_p1 }
 0x172   : > { %p2822_p9 = pneg %p2821_p7 }
 0x173   : > { %p2828_p2 = por %p2827_p0, %p2826_p8 }
 0x175   : > { %p2829_p6 = pnand %p2828_p2, %p2822_p9 }
 0x177   : > { %2832 = shalt.err (!%p2829_p6)
}
 0x178   : > { %s2833_s19 = scalar_lea.vmem %s669_s2, 16  ;;  %s3072_s0 = smov [#allocation21]  }
 0x179   : > { %p2834_p3 = scmp.ne.s32.totalorder %s669_s2, %s2833_s19  ;;  %s2837_s16 = sshll.u32 %s3072_s0, 4  ;;  %s2838_s16 = int_to_ptr.vmem [resolvable:$false] %s2837_s16 }
 0x17a   : > { %s2839_s25 = scalar_lea.vmem %s2838_s16, 32  ;;  %p2840_p10 = scmp.lt.s32.totalorder %s669_s2, %s2838_s16 }
 0x17b   : > { %p2835_p4 = pnand %p2834_p3, %p4088_p5  ;;  %p2841_p13 = scmp.lt.s32.totalorder %s2839_s25, %s2833_s19 }
 0x17d   : > { %p2836_p12 = pneg %p2835_p4  ;;  %p2842_p7 = por %p2841_p13, %p2840_p10 }
 0x17f   : > { %p2843_p1 = pnand %p2842_p7, %p2836_p12 }
 0x181   : > { %2846 = shalt.err (!%p2843_p1)
}
 0x182   : > { %s4097_s1 = scalar_lea.sflag [#allocation20], %s3305_s20  ;;  %s695_s24 = scalar_lea.vmem [#allocation24], %s3335_s30 }
 0x183   : > { %2346 = dma.hbm_to_vmem [thread:$0]  (%p4088_p5), %s3652_s3, 16, %s669_s2, %s4097_s1  }
 0x184   : > { %s702_s28 = sshll.u32 %s695_s24, 4  ;;  %s2847_s14 = scalar_lea.hbm %s3659_s10, 16  ;;  %s703_s28 = int_to_ptr.vmem [resolvable:$true] %s702_s28 }
 0x185   : > { %p2848_p9 = scmp.ne.s32.totalorder %s3659_s10, %s2847_s14  ;;  %s2851_s27 = scalar_lea.hbm %s4096_s26, 32 }
 0x186   : > { %p2852_p0 = scmp.lt.u32.totalorder %s3659_s10, %s4096_s26  ;;  %p2853_p2 = scmp.lt.u32.totalorder %s2851_s27, %s2847_s14 }
 0x187   : > { %p2849_p11 = pnand %p2848_p9, %p4088_p5  ;;  %p2855_p3 = scmp.lt.u32.totalorder %s2847_s14, %s3659_s10 }
 0x188   : > { %p2854_p6 = por %p2853_p2, %p2852_p0 }
 0x189   : > { %p2850_p8 = pneg %p2849_p11 }
 0x18a   : > { %p2856_p4 = por %p2855_p3, %p2854_p6 }
 0x18c   : > { %p2857_p12 = pnand %p2856_p4, %p2850_p8 }
 0x18e   : > { %2860 = shalt.err (!%p2857_p12)
}
 0x18f   : > { %s2861_s3 = scalar_lea.vmem %s703_s28, 16  ;;  %s3073_s2 = smov [#allocation24]  }
 0x190   : > { %p2862_p10 = scmp.ne.s32.totalorder %s703_s28, %s2861_s3  ;;  %s2865_s16 = sshll.u32 %s3073_s2, 4  ;;  %s2866_s16 = int_to_ptr.vmem [resolvable:$false] %s2865_s16 }
 0x191   : > { %s2867_s25 = scalar_lea.vmem %s2866_s16, 32  ;;  %p2868_p1 = scmp.lt.s32.totalorder %s703_s28, %s2866_s16 }
 0x192   : > { %p2863_p13 = pnand %p2862_p10, %p4088_p5  ;;  %p2869_p9 = scmp.lt.s32.totalorder %s2867_s25, %s2861_s3 }
 0x194   : > { %p2864_p7 = pneg %p2863_p13  ;;  %p2870_p11 = por %p2869_p9, %p2868_p1 }
 0x196   : > { %p2871_p0 = pnand %p2870_p11, %p2864_p7 }
 0x198   : > { %2874 = shalt.err (!%p2871_p0)
}
 0x199   : > { %s4098_s1 = scalar_lea.sflag [#allocation23], %s3305_s20  ;;  %s4099_s5 = sld [smem:[#allocation60_spill]] }
 0x19a   : > { %2348 = dma.hbm_to_vmem [thread:$0]  (%p4088_p5), %s3659_s10, 16, %s703_s28, %s4098_s1  }
 0x19b   : > { %s712_s27 = scalar_lea.vmem [#allocation25], %s3335_s30  ;;  %s710_s0 = scalar_lea.sflag [#allocation26], %s3335_s30 }
 0x19c   : > { %s719_s19 = sshll.u32 %s712_s27, 4  ;;  %s720_s19 = int_to_ptr.vmem [resolvable:$true] %s719_s19 }
 0x19f   : > { %s3704_s29 = scalar_lea.hbm %s4099_s5, %s3338_s18  ;;  %s2879_s28 = scalar_lea.hbm %s4099_s5, 32 }
 0x1a0   : > { %s2875_s20 = scalar_lea.hbm %s3704_s29, 16  ;;  %p2880_p3 = scmp.lt.u32.totalorder %s3704_s29, %s4099_s5 }
 0x1a1   : > { %p2876_p8 = scmp.ne.s32.totalorder %s3704_s29, %s2875_s20  ;;  %p2881_p4 = scmp.lt.u32.totalorder %s2879_s28, %s2875_s20 }
 0x1a2   : > { %p2883_p10 = scmp.lt.u32.totalorder %s2875_s20, %s3704_s29 }
 0x1a3   : > { %p2877_p2 = pnand %p2876_p8, %p4088_p5  ;;  %p2882_p12 = por %p2881_p4, %p2880_p3 }
 0x1a5   : > { %p2878_p6 = pneg %p2877_p2  ;;  %p2884_p13 = por %p2883_p10, %p2882_p12 }
 0x1a7   : > { %p2885_p7 = pnand %p2884_p13, %p2878_p6 }
 0x1a9   : > { %2888 = shalt.err (!%p2885_p7)
}
 0x1aa   : > { %s2889_s30 = scalar_lea.vmem %s720_s19, 16  ;;  %s3074_s16 = smov [#allocation25]  }
 0x1ab   : > { %p2890_p1 = scmp.ne.s32.totalorder %s720_s19, %s2889_s30  ;;  %s2893_s25 = sshll.u32 %s3074_s16, 4  ;;  %s2894_s25 = int_to_ptr.vmem [resolvable:$false] %s2893_s25 }
 0x1ac   : > { %s2895_s1 = scalar_lea.vmem %s2894_s25, 32  ;;  %p2896_p0 = scmp.lt.s32.totalorder %s720_s19, %s2894_s25 }
 0x1ad   : > { %p2891_p9 = pnand %p2890_p1, %p4088_p5  ;;  %p2897_p8 = scmp.lt.s32.totalorder %s2895_s1, %s2889_s30 }
 0x1af   : > { %p2892_p11 = pneg %p2891_p9  ;;  %p2898_p2 = por %p2897_p8, %p2896_p0 }
 0x1b1   : > { %p2899_p3 = pnand %p2898_p2, %p2892_p11 }
 0x1b3   : > { %2902 = shalt.err (!%p2899_p3)
}
 0x1b4   : > { %2349 = dma.hbm_to_vmem [thread:$0]  (%p4088_p5), %s3704_s29, 16, %s720_s19, %s710_s0  }
 0x1b5 PF: > { %p2175_p6 = scmp.ge.s32.totalorder %s3057_s23, 1  ;;  %p724_p4 = scmp.lt.s32.totalorder %s3057_s23, 5 }
 0x1b7   : > { %p725_p12 = pnand %p2175_p6, %p724_p4 }
 0x1b8   : > { %s3728_s24 = sand.u32 (!%p725_p12), 1, %s3033_s17   ;;  %p4100_p5 = scmp.ne.s32.totalorder (!%p725_p12), %s4065_s13, 0 }
 0x1b9   : > { %728 = sbr.rel (%p725_p12) target bundleno = 3113 (0xc29), region = 76  ;;  %s2176_s14 = sshll.u32 (!%p725_p12), %s3728_s24, 3 }
 0x1ba   : > { %s731_s27 = scalar_lea.sflag (!%p725_p12), [#allocation5], %s3728_s24  ;;  %s3734_s8 = scalar_lea.vmem (!%p725_p12), [#allocation4], %s2176_s14 }
 0x1c0   : > { %2976 = dma.done.wait (%p4100_p5), %s731_s27, 128  }
 0x1c1   : > { %2978 = vsyncadd (%p4100_p5), %s731_s27, 4294967168  ;;  %s4101_s29 = sld [smem:[#allocation43_spill]]  ;;  %s742_s20 = scalar_lea.vmem [#allocation7], %s3728_s24 }
 0x1c7   : > { %s3741_s19 = sand.u32 1, %s4101_s29  }
 0x1c8   : > { %s740_s0 = scalar_lea.sflag [#allocation8], %s3741_s19 }
 0x1c9   : > { %2980 = dma.done.wait (%p4100_p5), %s740_s0, 16  }
 0x1ca   : > { %2982 = vsyncadd (%p4100_p5), %s740_s0, 4294967280  ;;  %s4102_s3 = sld [smem:[#allocation38_spill]]  ;;  %s4103_s10 = sld [smem:[#allocation48_spill]] }
 0x1d0   : > { %s3750_s28 = sand.u32 1, %s4102_s3   ;;  %p4104_p10 = scmp.ne.s32.totalorder %s4103_s10, 0 }
 0x1d1   : > { %s3753_s2 = sshll.u32 %s3750_s28, 4 }
 0x1d2   : > { %s751_s18 = scalar_lea.vmem [#allocation9], %s3753_s2 }
 0x1d3   : > { %2984 = dma.done.wait (%p4104_p10), %s740_s0, 256  }
 0x1d4   : > { %2986 = vsyncadd (%p4104_p10), %s740_s0, 4294967040  ;;  %s757_s30 = scalar_lea.sflag [#allocation11], %s3741_s19  ;;  %s759_s13 = scalar_lea.vmem [#allocation10], %s3750_s28 }
 0x1d5   : > { %2988 = dma.done.wait (%p4104_p10), %s757_s30, 272  }
 0x1d6   : > { %2990 = vsyncadd (%p4104_p10), %s757_s30, 4294967024  ;;  %s774_s25 = scalar_lea.sflag [#allocation14], %s3741_s19 }
 0x1d7   : > { %2992 = dma.done.wait (%p4104_p10), %s774_s25, 272  }
 0x1d8   : > { %2994 = vsyncadd (%p4104_p10), %s774_s25, 4294967024  ;;  %s791_s29 = scalar_lea.sflag [#allocation17], %s3741_s19 }
 0x1d9   : > { %2996 = dma.done.wait (%p4104_p10), %s791_s29, 528  }
 0x1da   : > { %2998 = vsyncadd (%p4104_p10), %s791_s29, 4294966768  ;;  %s2180_s3 = sshll.u32 %s3750_s28, 5  ;;  %s808_s25 = scalar_lea.sflag [#allocation20], %s3741_s19 }
 0x1db   : > { %s3781_s30 = scalar_lea.vmem [#allocation18], %s2180_s3 }
 0x1dc   : > { %3000 = dma.done.wait (%p4104_p10), %s808_s25, 32  }
 0x1dd   : > { %3002 = vsyncadd (%p4104_p10), %s808_s25, 4294967264  ;;  %s818_s0 = scalar_lea.vmem [#allocation21], %s3750_s28  ;;  %s824_s29 = scalar_lea.sflag [#allocation23], %s3741_s19 }
 0x1de   : > { %s826_s27 = scalar_lea.vmem [#allocation22], %s3750_s28 }
 0x1df   : > { %3004 = dma.done.wait (%p4104_p10), %s824_s29, 32  }
 0x1e0   : > { %3006 = vsyncadd (%p4104_p10), %s824_s29, 4294967264  ;;  %s834_s3 = scalar_lea.vmem [#allocation24], %s3750_s28  ;;  %s840_s1 = scalar_lea.sflag [#allocation26], %s3750_s28 }
 0x1e1   : > { %s842_s16 = scalar_lea.vmem [#allocation25], %s3750_s28 }
 0x1e2   : > { %3008 = dma.done.wait (%p4104_p10), %s840_s1, 16  }
 0x1e3   : > { %3010 = vsyncadd (%p4104_p10), %s840_s1, 4294967280  ;;  %s3805_s19 = scalar_lea.vmem [#allocation27], %s2176_s14  ;;  %s4105_s25 = sld [smem:[#allocation41_spill]] }
 0x1e9   : > { %p2182_p13 = scmp.ne.s32.totalorder %s4105_s25, 0 }
 0x1ea   : > { %v948_v0 = vld [vmem:[%s3734_s8] sm:$0xff] (!%p2182_p13)  ;;  %vm949_vm0 = vcmask (!%p2182_p13), 261120  }
 0x1eb   : > { %947 = sbr.rel (%p2182_p13) target bundleno = 498 (0x1f2), region = 136  ;;  %950 = vst.msk [vmem:[#allocation2] sm:$0xff] (!%p2182_p13), %vm949_vm0, %v948_v0 }
 0x1f2 PF: > { %v2477_v1 = vld [vmem:[%s751_s18] sm:$0xff]   ;;  %v3075_v2 = vmov 0.0   ;;  %v2478_v3 = vld [vmem:[%s751_s18 + $0x8] sm:$0xff]   ;;  %vm3076_vm1 = vmmov 0   ;;  %vm979_vm2 = vcmask 261120   ;;  %s3077_s14 = smov 120   ;;  %v1076_v24 = vlaneseq }
 0x1f3   : > { %2252 = vmatprep.subr.bf16.mxu0 %v3075_v2  ;;  %2260 = vmatprep.subr.bf16.mxu1 %v3075_v2  ;;  %v3817_v4 = vld [vmem:[#allocation2] sm:$0xff]  ;;  %s3078_s8 = smov 96   ;;  %s3079_s10 = smov 80   ;;  %vm1027_vm3 = vcmask 64512   ;;  %vm1099_vm5 = vcmask 1043456   ;;  %vm1260_vm6 = vcmask 130112  }
 0x1f4   : > { %2253 = vmatpush3.bf16.msra.mxu0 %v2477_v1  ;;  %2256 = vmatprep.mubr.msk.bf16.mxu0 %vm3076_vm1, %v3075_v2  ;;  %v952_v5 = vpack.c.bf16 %v3817_v4, %v3817_v4  ;;  %v2183_v6 = vld [vmem:[%s759_s13] ss:$0 sm:$0xff]  ;;  %s3080_s18 = smov 88   ;;  %s3081_s13 = smov 72   ;;  %v1077_v26 = vshrl.u32 %v1076_v24, 7  ;;  %vm1378_vm7 = vcmask 195712  }
 0x1f5   : > { %2254 = vmatprep.subr.bf16.mxu0 %v3075_v2  ;;  %2262 = vmatprep.mubr.msk.bf16.mxu1 %vm3076_vm1, %v3075_v2  ;;  %s3082_s1 = smov 112   ;;  %s3083_s29 = smov 104   ;;  %v953_v25 = vld [vmem:[%s742_s20] sm:$0x1]  ;;  %vm1496_vm8 = vcmask 261312   ;;  %vm1712_vm11 = vcmask 523264  }
 0x1f6   : > { %vm954_vm4 = vcmp.eq.f32.partialorder %v953_v25, 0.0  ;;  %v1078_v27 = vsub.s32 0, %v1077_v26  ;;  %s3084_s20 = smov 56   ;;  %s3085_s25 = smov 64  }
 0x1f7   : > { %v955_v28 = vsel %vm954_vm4, -1e+09, %v3075_v2 }
 0x1f8   : > { %2255 = vmatpush3.bf16.msra.mxu0 %v2478_v3  ;;  %v1079_v29 = vrot.slane %v955_v28, %v1078_v27 }
 0x1f9   : > { %2266 = vmatprep.subr.bf16.mxu0 %v3075_v2 }
 0x1fb   : > { %2257 = vmatmul.mubr.msk.bf16.vlgmr.msra.gmra.mrb[0].mxu0 %vm979_vm2, %v952_v5 }
 0x1fc   : > { %2268 = vmatprep.mubr.msk.bf16.mxu0 %vm3076_vm1, %v3075_v2 }
 0x2ce   : > { %v1017_v7 = vpop.f32.mrb[0].mxu0 }
 0x2cf   : > { %v1018_v8 = vadd.f32 %v2183_v6, %v1017_v7  ;;  %v2258_v9 = vpop.f32.mrb[1].mxu0 }
 0x2d0   : > { %v1020_v10 = vpop.f32.mrb[2].mxu0 }
 0x2d1   : > { %v3830_v11 = vpack.c.bf16 %v1018_v8, %v1018_v8  ;;  %v2259_v12 = vpop.f32.mrb[3].mxu0 }
 0x2d3   : > { %1144 = vrot.lane.b32.xlu1 %v3830_v11, %s3077_s14  ;;  %1025 = vrot.lane.b32.xlu0 %v3830_v11, %s3078_s8  ;;  %s3086_s14 = smov 40   ;;  %s3087_s8 = smov 48  }
 0x2d7   : > { %1264 = vrot.lane.b32.xlu1 %v3830_v11, %s3079_s10  ;;  %1146 = vrot.lane.b32.xlu0 %v3830_v11, %s3080_s18  ;;  %s3088_s10 = smov 8   ;;  %s4106_s18 = scalar_lea.vmem [#allocation12], %s3753_s2 }
 0x2db   : > { %1382 = vrot.lane.b32.xlu1 %v3830_v11, %s3081_s13  ;;  %1262 = vrot.lane.b32.xlu0 %v3830_v11, %s3082_s1  ;;  %s4107_s13 = smov %s4106_s18  ;;  %s3089_s1 = smov 16  }
 0x2df   : > { %1380 = vrot.lane.b32.xlu0 %v3830_v11, %s3083_s29  ;;  %s3090_s29 = smov 24  }
 0x345   : > { %v1026_v13 = vpop.permute.xlu0 %1025  ;;  %v1145_v16 = vpop.permute.xlu1 %1144 }
 0x346   : > { %v1032_v14 = vsel %vm1027_vm3, %v1026_v13, 0 }
 0x347   : > { %2261 = vmatpush3.bf16.xpose.msra.mxu1 %v1032_v14 }
 0x348   : > { %2272 = vmatprep.subr.bf16.mxu1 %v3075_v2 }
 0x349   : > { %v1147_v15 = vpop.permute.xlu0 %1146  ;;  %v1265_v18 = vpop.permute.xlu1 %1264 }
 0x34a   : > { %v1152_v17 = vsel %vm1027_vm3, %v1147_v15, 0  ;;  %v1270_v19 = vsel %vm1027_vm3, %v1265_v18, 0 }
 0x34d   : > { %v1383_v20 = vpop.permute.xlu1 %1382  ;;  %v1263_v21 = vpop.permute.xlu0 %1262 }
 0x34e   : > { %2263 = vmatmul.mubr.msk.bf16.vlgmr.msra.gmra.mrb[0].mxu1 %vm1027_vm3, %v3830_v11  ;;  %v1388_v22 = vsel %vm1027_vm3, %v1383_v20, 0 }
 0x34f   : > { %2273 = vmatpush3.bf16.xpose.msra.mxu1 %v1152_v17  ;;  %2274 = vmatprep.mubr.msk.bf16.mxu1 %vm3076_vm1, %v3075_v2 }
 0x350   : > { %2284 = vmatprep.subr.bf16.mxu1 %v3075_v2 }
 0x351   : > { %v1381_v23 = vpop.permute.xlu0 %1380 }
 0x356   : > { %2275 = vmatmul.mubr.msk.bf16.vlgmr.msra.gmra.mrb[4].mxu1 %vm1027_vm3, %v1145_v16 }
 0x357   : > { %2285 = vmatpush3.bf16.xpose.msra.mxu1 %v1270_v19  ;;  %2286 = vmatprep.mubr.msk.bf16.mxu1 %vm3076_vm1, %v3075_v2 }
 0x358   : > { %2296 = vmatprep.subr.bf16.mxu1 %v3075_v2 }
 0x35e   : > { %2287 = vmatmul.mubr.msk.bf16.vlgmr.msra.gmra.mrb[8].mxu1 %vm1027_vm3, %v1263_v21 }
 0x35f   : > { %2297 = vmatpush3.bf16.xpose.msra.mxu1 %v1388_v22  ;;  %2298 = vmatprep.mubr.msk.bf16.mxu1 %vm3076_vm1, %v3075_v2 }
 0x360   : > { %2308 = vmatprep.subr.bf16.mxu1 %v3075_v2 }
 0x366   : > { %2299 = vmatmul.mubr.msk.bf16.vlgmr.msra.gmra.mrb[12].mxu1 %vm1027_vm3, %v1381_v23 }
 0x367   : > { %2312 = vmatprep.mubr.msk.bf16.mxu1 %vm3076_vm1, %v3075_v2 }
 0x421   : > { %v1068_v30 = vpop.f32.mrb[0].mxu1 }
 0x422   : > { %v1074_v31 = vmul.f32 0.35355338, %v1068_v30  ;;  %v2264_v32 = vpop.f32.mrb[1].mxu1 }
 0x423   : > { %v1071_v33 = vpop.f32.mrb[2].mxu1 }
 0x424   : > { %v2265_v34 = vpop.f32.mrb[3].mxu1  ;;  %v1081_v35 = vadd.f32 %v1079_v29, %v1074_v31 }
 0x426   : > { %v1082_v36 = vsel %vm1027_vm3, %v1081_v35, -inf }
 0x427   : > { %1083 = vmax.xlane.f32.xlu1 %v1082_v36 }
 0x429   : > { %v1188_v37 = vpop.f32.mrb[4].mxu1 }
 0x42a   : > { %v1194_v38 = vmul.f32 0.35355338, %v1188_v37  ;;  %v2276_v39 = vpop.f32.mrb[5].mxu1 }
 0x42b   : > { %v1191_v40 = vpop.f32.mrb[6].mxu1 }
 0x42c   : > { %v2277_v41 = vpop.f32.mrb[7].mxu1  ;;  %v1195_v42 = vadd.f32 %v1194_v38, %v1079_v29 }
 0x42e   : > { %v1196_v43 = vsel %vm1027_vm3, %v1195_v42, -inf }
 0x42f   : > { %1197 = vmax.xlane.f32.xlu0 %v1196_v43 }
 0x431   : > { %v1306_v44 = vpop.f32.mrb[8].mxu1 }
 0x432   : > { %v1312_v45 = vmul.f32 0.35355338, %v1306_v44  ;;  %v2288_v46 = vpop.f32.mrb[9].mxu1 }
 0x433   : > { %v1309_v47 = vpop.f32.mrb[10].mxu1 }
 0x434   : > { %v2289_v48 = vpop.f32.mrb[11].mxu1  ;;  %v1313_v49 = vadd.f32 %v1312_v45, %v1079_v29 }
 0x435   : > { %v2479_v48 = vld [vmem:[%s4106_s18] sm:$0xff]  }
 0x436   : > { %v1314_v50 = vsel %vm1027_vm3, %v1313_v49, -inf  ;;  %2309 = vmatpush3.bf16.msra.mxu1 %v2479_v48 }
 0x437   : > { %1315 = vmax.xlane.f32.xlu0 %v1314_v50  ;;  %2310 = vmatprep.subr.bf16.mxu1 %v3075_v2 }
 0x439   : > { %v1424_v51 = vpop.f32.mrb[12].mxu1 }
 0x43a   : > { %v1430_v52 = vmul.f32 0.35355338, %v1424_v51  ;;  %v2300_v53 = vpop.f32.mrb[13].mxu1 }
 0x43b   : > { %v1427_v54 = vpop.f32.mrb[14].mxu1 }
 0x43c   : > { %v2301_v55 = vpop.f32.mrb[15].mxu1  ;;  %v1431_v56 = vadd.f32 %v1430_v52, %v1079_v29 }
 0x43e   : > { %v1432_v57 = vsel %vm1027_vm3, %v1431_v56, -inf }
 0x43f   : > { %1433 = vmax.xlane.f32.xlu1 %v1432_v57 }
 0x4b4   : > { %v1084_v58 = vpop.xlane.xlu1 %1083 }
 0x4b5   : > { %v1085_v59 = vsub.f32 %v1081_v35, %v1084_v58 }
 0x4b7   : > { %v1086_v60 = vmul.f32 1.442695, %v1085_v59 }
 0x4b9   : > { %2487 = vpow2.f32 %v1086_v60 }
 0x4bc   : > { %v1198_v61 = vpop.xlane.xlu0 %1197 }
 0x4bd   : > { %v1199_v62 = vsub.f32 %v1195_v42, %v1198_v61 }
 0x4bf   : > { %v1200_v63 = vmul.f32 1.442695, %v1199_v62 }
 0x4c1   : > { %2489 = vpow2.f32 %v1200_v63 }
 0x4c3   : > { %v2488_v0 = vpop.eup %2487 }
 0x4c4   : > { %v1316_v1 = vpop.xlane.xlu0 %1315  ;;  %v1088_v3 = vsel %vm1027_vm3, %v2488_v0, 0.0 }
 0x4c5   : > { %v1317_v5 = vsub.f32 %v1313_v49, %v1316_v1  ;;  %1089 = vadd.xlane.f32.xlu0 %v1088_v3  ;;  %v2480_v49 = vld [vmem:[%s4107_s13 + $0x8] sm:$0xff]  }
 0x4c6   : > { %2311 = vmatpush3.bf16.msra.mxu1 %v2480_v49 }
 0x4c7   : > { %v1318_v6 = vmul.f32 1.442695, %v1317_v5  ;;  %2324 = vmatprep.subr.bf16.mxu1 %v3075_v2 }
 0x4c9   : > { %2491 = vpow2.f32 %v1318_v6 }
 0x4cb   : > { %v2490_v7 = vpop.eup %2489 }
 0x4cc   : > { %v1202_v8 = vsel %vm1027_vm3, %v2490_v7, 0.0  ;;  %v1434_v12 = vpop.xlane.xlu1 %1433 }
 0x4cd   : > { %1203 = vadd.xlane.f32.xlu1 %v1202_v8  ;;  %v1435_v13 = vsub.f32 %v1431_v56, %v1434_v12 }
 0x4cf   : > { %v1436_v14 = vmul.f32 1.442695, %v1435_v13 }
 0x4d1   : > { %2493 = vpow2.f32 %v1436_v14 }
 0x4d3   : > { %v2492_v9 = vpop.eup %2491 }
 0x4d4   : > { %v1320_v10 = vsel %vm1027_vm3, %v2492_v9, 0.0 }
 0x4d5   : > { %1321 = vadd.xlane.f32.xlu0 %v1320_v10 }
 0x4db   : > { %v2494_v15 = vpop.eup %2493 }
 0x4dc   : > { %v1438_v16 = vsel %vm1027_vm3, %v2494_v15, 0.0 }
 0x4de   : > { %1208 = vrot.lane.b32.xlu1 %v3830_v11, %s3084_s20  ;;  %s4108_s20 = scalar_lea.vmem [#allocation13], %s3750_s28 }
 0x4df   : > { %v2195_v63 = vld [vmem:[%s4108_s20] ss:$0 sm:$0xff] }
 0x4eb   : > { %1094 = vrot.lane.b32.xlu0 %v3830_v11, %s3085_s25  ;;  %s4109_s25 = scalar_lea.vmem [#allocation15], %s3753_s2  ;;  %s4111_s2 = scalar_lea.vmem [#allocation16], %s3750_s28 }
 0x4ef   : > { %1444 = vrot.lane.b32.xlu0 %v3830_v11, %s3086_s14  ;;  %s4110_s14 = smov %s4109_s25 }
 0x502   : > { %1439 = vadd.xlane.f32.xlu1 %v1438_v16  ;;  %v2482_v16 = vld [vmem:[%s4110_s14 + $0x8] sm:$0xff]  }
 0x513   : > { %1326 = vrot.lane.b32.xlu1 %v3830_v11, %s3087_s8 }
 0x552   : > { %v1090_v17 = vpop.xlane.xlu0 %1089 }
 0x553   : > { %2495 = vrcp.f32 %v1090_v17  ;;  %v2484_v17 = vld [vmem:[%s3781_s30 + $0x8] sm:$0xff]  }
 0x55a   : > { %v1204_v18 = vpop.xlane.xlu1 %1203 }
 0x55b   : > { %2497 = vrcp.f32 %v1204_v18 }
 0x55d   : > { %v2496_v19 = vpop.eup %2495 }
 0x55e   : > { %v1092_v21 = vmul.f32 %v2496_v19, %v2488_v0  ;;  %v1209_v24 = vpop.permute.xlu1 %1208 }
 0x55f   : > { %v1214_v27 = vsel %vm1099_vm5, %v1209_v24, 0 }
 0x560   : > { %v1093_v25 = vpack.c.bf16 %v1092_v21, %v1092_v21 }
 0x562   : > { %v1322_v20 = vpop.xlane.xlu0 %1321 }
 0x563   : > { %2499 = vrcp.f32 %v1322_v20 }
 0x565   : > { %v2498_v26 = vpop.eup %2497 }
 0x566   : > { %v1095_v22 = vpop.permute.xlu0 %1094  ;;  %v1206_v11 = vmul.f32 %v2498_v26, %v2490_v7 }
 0x567   : > { %v1101_v23 = vsel %vm1099_vm5, %v1095_v22, 0 }
 0x568   : > { %2267 = vmatpush3.bf16.msra.mxu0 %v1101_v23  ;;  %v1207_v28 = vpack.c.bf16 %v1206_v11, %v1206_v11 }
 0x569   : > { %2278 = vmatprep.subr.bf16.mxu0 %v3075_v2 }
 0x56a   : > { %v1445_v34 = vpop.permute.xlu0 %1444 }
 0x56b   : > { %2269 = vmatmul.mubr.msk.bf16.vlgmr.msra.gmra.mrb[4].mxu0 %vm1027_vm3, %v1093_v25  ;;  %v1450_v36 = vsel %vm1099_vm5, %v1445_v34, 0  ;;  %v2201_v34 = vld [vmem:[%s4111_s2] ss:$0 sm:$0xff] }
 0x56c   : > { %2279 = vmatpush3.bf16.msra.mxu0 %v1214_v27  ;;  %2280 = vmatprep.mubr.msk.bf16.mxu0 %vm3076_vm1, %v3075_v2  ;;  %v2199_v27 = vld [vmem:[%s818_s0] ss:$0 sm:$0xff]  ;;  %s4113_s0 = sld [smem:[#allocation41_spill]] }
 0x56d   : > { %2290 = vmatprep.subr.bf16.mxu0 %v3075_v2  ;;  %v2500_v29 = vpop.eup %2499 }
 0x56e   : > { %v1324_v31 = vmul.f32 %v2500_v29, %v2492_v9 }
 0x570   : > { %v1325_v35 = vpack.c.bf16 %v1324_v31, %v1324_v31 }
 0x572   : > { %p2213_p7 = scmp.ne.s32.totalorder %s4113_s0, 1 }
 0x573   : > { %2281 = vmatmul.mubr.msk.bf16.vlgmr.msra.gmra.mrb[8].mxu0 %vm1027_vm3, %v1207_v28  ;;  %v2200_v28 = vld [vmem:[%s826_s27] ss:$0 sm:$0xff]  ;;  %s4112_s27 = scalar_lea.vmem [#allocation19], %s3750_s28 }
 0x574   : > { %2292 = vmatprep.mubr.msk.bf16.mxu0 %vm3076_vm1, %v3075_v2 }
 0x58f   : > { %v1440_v30 = vpop.xlane.xlu1 %1439 }
 0x590   : > { %2501 = vrcp.f32 %v1440_v30 }
 0x593   : > { %v1327_v32 = vpop.permute.xlu1 %1326 }
 0x594   : > { %v1332_v33 = vsel %vm1099_vm5, %v1327_v32, 0  ;;  %v2485_v32 = vld [vmem:[%s3781_s30 + $0x10] sm:$0xff]  }
 0x595   : > { %2291 = vmatpush3.bf16.msra.mxu0 %v1332_v33  ;;  %v2486_v33 = vld [vmem:[%s3781_s30 + $0x18] sm:$0xff]  }
 0x596   : > { %2302 = vmatprep.subr.bf16.mxu0 %v3075_v2 }
 0x598   : > { %2293 = vmatmul.mubr.msk.bf16.vlgmr.msra.gmra.mrb[12].mxu0 %vm1027_vm3, %v1325_v35 }
 0x599   : > { %2303 = vmatpush3.bf16.msra.mxu0 %v1450_v36  ;;  %2304 = vmatprep.mubr.msk.bf16.mxu0 %vm3076_vm1, %v3075_v2 }
 0x59a   : > { %v2502_v37 = vpop.eup %2501  ;;  %2316 = vmatprep.subr.bf16.mxu0 %v3075_v2 }
 0x59b   : > { %v1442_v38 = vmul.f32 %v2502_v37, %v2494_v15  ;;  %v2481_v15 = vld [vmem:[%s4109_s25] sm:$0xff]  }
 0x59d   : > { %v1443_v39 = vpack.c.bf16 %v1442_v38, %v1442_v38 }
 0x5a0   : > { %2305 = vmatmul.mubr.msk.bf16.vlgmr.msra.gmra.mrb[16].mxu0 %vm1027_vm3, %v1443_v39 }
 0x5a1   : > { %2320 = vmatprep.mubr.msk.bf16.mxu0 %vm3076_vm1, %v3075_v2  ;;  %2317 = vmatpush3.bf16.msra.mxu0 %v2481_v15 }
 0x5a2   : > { %2318 = vmatprep.subr.bf16.mxu0 %v3075_v2 }
 0x5a5   : > { %2319 = vmatpush3.bf16.msra.mxu0 %v2482_v16 }
 0x63e   : > { %v1137_v40 = vpop.f32.mrb[4].mxu0 }
 0x63f   : > { %1143 = vst.msk [vmem:[#allocation3] sm:$0xff] %vm1027_vm3, %v1137_v40  ;;  %v2270_v41 = vpop.f32.mrb[5].mxu0 }
 0x640   : > { %v1140_v42 = vpop.f32.mrb[6].mxu0 }
 0x641   : > { %v2271_v43 = vpop.f32.mrb[7].mxu0  ;;  %v2205_v42 = vld [vmem:[%s4112_s27] ss:$0 sm:$0xff] }
 0x646   : > { %v1250_v44 = vpop.f32.mrb[8].mxu0 }
 0x647   : > { %1257 = vrot.lane.b32.xlu1 %v1250_v44, %s3088_s10  ;;  %v2282_v45 = vpop.f32.mrb[9].mxu0 }
 0x648   : > { %v1253_v46 = vpop.f32.mrb[10].mxu0 }
 0x649   : > { %v2283_v47 = vpop.f32.mrb[11].mxu0 }
 0x66b   : > { %v1368_v50 = vpop.f32.mrb[12].mxu0 }
 0x66c   : > { %1375 = vrot.lane.b32.xlu0 %v1368_v50, %s3089_s1  ;;  %v2294_v51 = vpop.f32.mrb[13].mxu0 }
 0x66d   : > { %v1371_v52 = vpop.f32.mrb[14].mxu0 }
 0x66e   : > { %v2295_v53 = vpop.f32.mrb[15].mxu0 }
 0x673   : > { %v1486_v54 = vpop.f32.mrb[16].mxu0 }
 0x674   : > { %1493 = vrot.lane.b32.xlu1 %v1486_v54, %s3090_s29  ;;  %v2306_v55 = vpop.f32.mrb[17].mxu0 }
 0x675   : > { %v1489_v56 = vpop.f32.mrb[18].mxu0 }
 0x676   : > { %v2307_v57 = vpop.f32.mrb[19].mxu0 }
 0x6b9   : > { %v1258_v58 = vpop.permute.xlu1 %1257 }
 0x6ba   : > { %1261 = vst.msk [vmem:[#allocation3] sm:$0xff] %vm1260_vm6, %v1258_v58 }
 0x6de   : > { %v1376_v59 = vpop.permute.xlu0 %1375 }
 0x6df   : > { %1379 = vst.msk [vmem:[#allocation3] sm:$0xff] %vm1378_vm7, %v1376_v59 }
 0x6e6   : > { %v1494_v60 = vpop.permute.xlu1 %1493 }
 0x6e7   : > { %1497 = vst.msk [vmem:[#allocation3] sm:$0xff] %vm1496_vm8, %v1494_v60 }
 0x6ee   : > { %v1498_v61 = vld [vmem:[#allocation3] sm:$0xff] }
 0x6ef   : > { %v1499_v62 = vpack.c.bf16 %v1498_v61, %v1498_v61 }
 0x6f1   : > { %2313 = vmatmul.mubr.msk.bf16.vlgmr.msra.gmra.mrb[16].mxu1 %vm979_vm2, %v1499_v62 }
 0x6f2   : > { %2332 = vmatprep.mubr.msk.bf16.mxu1 %vm3076_vm1, %v3075_v2 }
 0x7c4   : > { %v1560_v0 = vpop.f32.mrb[16].mxu1 }
 0x7c5   : > { %v1561_v1 = vadd.f32 %v2195_v63, %v1560_v0  ;;  %v2314_v3 = vpop.f32.mrb[17].mxu1  ;;  %v2211_v63 = vld [vmem:[%s834_s3] ss:$0 sm:$0xff] }
 0x7c6   : > { %v1563_v5 = vpop.f32.mrb[18].mxu1 }
 0x7c7   : > { %v2315_v6 = vpop.f32.mrb[19].mxu1  ;;  %v1566_v7 = vadd.f32 %v1561_v1, %v3817_v4  ;;  %v2483_v4 = vld [vmem:[%s3781_s30] sm:$0xff]   ;;  %v2212_v1 = vld [vmem:[%s842_s16] ss:$0 sm:$0xff] }
 0x7c8   : > { %2325 = vmatpush3.bf16.msra.mxu1 %v2483_v4 }
 0x7c9   : > { %v1569_v8 = vsel %vm979_vm2, %v1566_v7, 0.0  ;;  %2326 = vmatprep.subr.bf16.mxu1 %v3075_v2 }
 0x7ca   : > { %1570 = vadd.xlane.f32.xlu0 %v1569_v8 }
 0x7cc   : > { %2327 = vmatpush3.bf16.msra.mxu1 %v2484_v17 }
 0x7cd   : > { %2328 = vmatprep.subr.bf16.mxu1 %v3075_v2 }
 0x7d0   : > { %2329 = vmatpush3.bf16.msra.mxu1 %v2485_v32 }
 0x7d1   : > { %2330 = vmatprep.subr.bf16.mxu1 %v3075_v2 }
 0x7d4   : > { %2331 = vmatpush3.bf16.msra.mxu1 %v2486_v33 }
 0x857   : > { %v1571_v9 = vpop.xlane.xlu0 %1570 }
 0x858   : > { %v1573_v10 = vmul.f32 0.03125, %v1571_v9 }
 0x85a   : > { %v1574_v12 = vsub.f32 %v1566_v7, %v1573_v10 }
 0x85c   : > { %v1575_v13 = vmul.f32 %v1574_v12, %v1574_v12 }
 0x85e   : > { %v1576_v14 = vsel %vm979_vm2, %v1575_v13, 0.0 }
 0x85f   : > { %1577 = vadd.xlane.f32.xlu1 %v1576_v14 }
 0x8ec   : > { %v1578_v18 = vpop.xlane.xlu1 %1577 }
 0x8ed   : > { %v1579_v19 = vmul.f32 0.032258064, %v1578_v18 }
 0x8ef   : > { %2503 = vrsqrt.f32 %v1579_v19  ;;  %vm1582_vm9 = vcmp.eq.f32.partialorder %v1579_v19, inf  ;;  %v1585_v22 = vand.u32 2147483648, %v1579_v19  ;;  %vm1584_vm10 = vcmp.eq.f32.partialorder %v1579_v19, 0.0 }
 0x8f9   : > { %v2504_v20 = vpop.eup %2503 }
 0x8fa   : > { %v1581_v21 = vmul.f32 %v2504_v20, %v1579_v19 }
 0x8fc   : > { %v1583_v23 = vsel %vm1582_vm9, %v1579_v19, %v1581_v21 }
 0x8fd   : > { %v1586_v24 = vsel %vm1584_vm10, %v1585_v22, %v1583_v23 }
 0x8fe   : > { %v1587_v25 = vadd.f32 1e-06, %v1586_v24 }
 0x900   : > { %2505 = vrcp.f32 %v1587_v25 }
 0x90a   : > { %v2506_v26 = vpop.eup %2505 }
 0x90b   : > { %v1589_v11 = vmul.f32 %v2506_v26, %v1574_v12 }
 0x90d   : > { %v1596_v29 = vmul.f32 %v2199_v27, %v1589_v11 }
 0x90f   : > { %v1603_v30 = vadd.f32 %v2200_v28, %v1596_v29 }
 0x911   : > { %v1604_v31 = vpack.c.bf16 %v1603_v30, %v1603_v30 }
 0x913   : > { %2321 = vmatmul.mubr.msk.bf16.vlgmr.msra.gmra.mrb[20].mxu0 %vm979_vm2, %v1604_v31 }
 0x9e6   : > { %v1665_v35 = vpop.f32.mrb[20].mxu0 }
 0x9e7   : > { %v1666_v36 = vadd.f32 %v2201_v34, %v1665_v35  ;;  %v2322_v37 = vpop.f32.mrb[21].mxu0 }
 0x9e8   : > { %v1668_v38 = vpop.f32.mrb[22].mxu0 }
 0x9e9   : > { %v1671_v39 = vmax.f32 %v1666_v36, 0.0  ;;  %v2323_v40 = vpop.f32.mrb[23].mxu0 }
 0x9eb   : > { %v1672_v41 = vpack.c.bf16 %v1671_v39, %v1671_v39 }
 0x9ed   : > { %2333 = vmatmul.mubr.msk.bf16.vlgmr.msra.gmra.mrb[20].mxu1 %vm1712_vm11, %v1672_v41 }
 0xac0   : > { %v1750_v43 = vpop.f32.mrb[20].mxu1 }
 0xac1   : > { %v1751_v44 = vadd.f32 %v2205_v42, %v1750_v43  ;;  %v2334_v45 = vpop.f32.mrb[21].mxu1 }
 0xac2   : > { %v1753_v46 = vpop.f32.mrb[22].mxu1 }
 0xac3   : > { %v2335_v2 = vpop.f32.mrb[23].mxu1  ;;  %v1756_v47 = vadd.f32 %v1751_v44, %v1603_v30 }
 0xac5   : > { %v1759_v48 = vsel %vm979_vm2, %v1756_v47, 0.0 }
 0xac6   : > { %1760 = vadd.xlane.f32.xlu0 %v1759_v48 }
 0xb53   : > { %v1761_v49 = vpop.xlane.xlu0 %1760 }
 0xb54   : > { %v1762_v50 = vmul.f32 0.03125, %v1761_v49 }
 0xb56   : > { %v1763_v51 = vsub.f32 %v1756_v47, %v1762_v50 }
 0xb58   : > { %v1764_v52 = vmul.f32 %v1763_v51, %v1763_v51 }
 0xb5a   : > { %v1765_v53 = vsel %vm979_vm2, %v1764_v52, 0.0 }
 0xb5b   : > { %1766 = vadd.xlane.f32.xlu0 %v1765_v53 }
 0xbe8   : > { %v1767_v54 = vpop.xlane.xlu0 %1766 }
 0xbe9   : > { %v1768_v55 = vmul.f32 0.032258064, %v1767_v54 }
 0xbeb   : > { %2507 = vrsqrt.f32 %v1768_v55  ;;  %vm1771_vm12 = vcmp.eq.f32.partialorder %v1768_v55, inf  ;;  %v1774_v58 = vand.u32 2147483648, %v1768_v55  ;;  %vm1773_vm13 = vcmp.eq.f32.partialorder %v1768_v55, 0.0 }
 0xbf5   : > { %v2508_v56 = vpop.eup %2507 }
 0xbf6   : > { %v1770_v57 = vmul.f32 %v2508_v56, %v1768_v55 }
 0xbf8   : > { %v1772_v59 = vsel %vm1771_vm12, %v1768_v55, %v1770_v57 }
 0xbf9   : > { %v1775_v60 = vsel %vm1773_vm13, %v1774_v58, %v1772_v59 }
 0xbfa   : > { %v1776_v61 = vadd.f32 1e-06, %v1775_v60 }
 0xbfc   : > { %2509 = vrcp.f32 %v1776_v61 }
 0xc06   : > { %v2510_v62 = vpop.eup %2509 }
 0xc07   : > { %v1778_v0 = vmul.f32 %v2510_v62, %v1763_v51  ;;  %1797 = sbr.rel (%p2213_p7) target bundleno = 3086 (0xc0e), region = 140 }
 0xc09   : > { %v1785_v3 = vmul.f32 %v2211_v63, %v1778_v0 }
 0xc0b   : > { %v1792_v5 = vadd.f32 %v2212_v1, %v1785_v3 }
 0xc0d   : > { %1793 = vst.msk [vmem:[#allocation2] sm:$0xff] %vm979_vm2, %v1792_v5  ;;  %1798 = vst.msk [vmem:[%s3805_s19] sm:$0xff] (!%p2213_p7), %vm979_vm2, %v1792_v5 }
 0xc0e PF: > { %s4114_s30 = sld [smem:[#allocation42_spill]]  ;;  %s4115_s8 = sld [smem:[#allocation49_spill]] }
 0xc0f   : > { %s4116_s28 = sld [smem:[#allocation61_spill]]  ;;  %s1813_s13 = sshll.u32 %s3805_s19, 4  ;;  %s1814_s13 = int_to_ptr.vmem [resolvable:$true] %s1813_s13 }
 0xc10   : > { %s1800_s1 = scalar_lea.sflag [#allocation6], %s3728_s24  ;;  %s2903_s29 = scalar_lea.vmem %s1814_s13, 128 }
 0xc11   : > { %p2904_p1 = scmp.ne.s32.totalorder %s1814_s13, %s2903_s29  ;;  %s3091_s20 = smov [#allocation27]  }
 0xc12   : > { %s2907_s25 = sshll.u32 %s3091_s20, 4  ;;  %s2908_s25 = int_to_ptr.vmem [resolvable:$false] %s2907_s25 }
 0xc13   : > { %s2909_s14 = scalar_lea.vmem %s2908_s25, 256  ;;  %p2910_p8 = scmp.lt.s32.totalorder %s1814_s13, %s2908_s25 }
 0xc14   : > { %s2215_s10 = sshll.u32 %s4114_s30, 7  ;;  %p4117_p9 = scmp.ne.s32.totalorder %s4115_s8, 0 }
 0xc15   : > { %s3945_s16 = scalar_lea.hbm %s4116_s28, %s2215_s10  ;;  %p2911_p2 = scmp.lt.s32.totalorder %s2909_s14, %s2903_s29 }
 0xc16   : > { %p2905_p11 = pnand %p2904_p1, %p4117_p9 }
 0xc17   : > { %p2912_p3 = por %p2911_p2, %p2910_p8 }
 0xc18   : > { %p2906_p0 = pneg %p2905_p11 }
 0xc1a   : > { %p2913_p6 = pnand %p2912_p3, %p2906_p0 }
 0xc1c   : > { %2916 = shalt.err (!%p2913_p6)
}
 0xc1d   : > { %s2917_s24 = scalar_lea.hbm %s3945_s16, 128  ;;  %s2921_s27 = scalar_lea.hbm %s4116_s28, 256 }
 0xc1e   : > { %p2918_p4 = scmp.ne.s32.totalorder %s3945_s16, %s2917_s24  ;;  %p2922_p10 = scmp.lt.u32.totalorder %s3945_s16, %s4116_s28 }
 0xc1f   : > { %p2923_p13 = scmp.lt.u32.totalorder %s2921_s27, %s2917_s24  ;;  %p2925_p1 = scmp.lt.u32.totalorder %s2917_s24, %s3945_s16 }
 0xc20   : > { %p2919_p12 = pnand %p2918_p4, %p4117_p9 }
 0xc21   : > { %p2924_p7 = por %p2923_p13, %p2922_p10 }
 0xc22   : > { %p2920_p5 = pneg %p2919_p12 }
 0xc23   : > { %p2926_p11 = por %p2925_p1, %p2924_p7 }
 0xc25   : > { %p2927_p0 = pnand %p2926_p11, %p2920_p5 }
 0xc27   : > { %2930 = shalt.err (!%p2927_p0)
}
 0xc28   : > { %2364 = dma.vmem_to_hbm [thread:$0]  (%p4117_p9), %s1814_s13, 128, %s3945_s16, %s1800_s1  }
 0xc29 PF: > { %s4118_s10 = sld [smem:[#allocation39_spill]]  ;;  %s4119_s3 = sld [smem:[#allocation50_spill]] }
 0xc2a   : > { %p2370_p8 = scmp.ge.s32.totalorder %s3057_s23, 2 }
 0xc2f   : > { %s1825_s18 = sand.u32 1, %s4118_s10   ;;  %p4120_p2 = scmp.ne.s32.totalorder %s4119_s3, 0 }
 0xc30   : > { %s1826_s29 = scalar_lea.sflag [#allocation6], %s1825_s18 }
 0xc31   : > { %p2367_p3 = pnand %p2370_p8, %p4120_p2 }
 0xc33   : > { %3012 = dma.done.wait (!%p2367_p3), %s1826_s29, 128  }
 0xc34   : > { %3014 = vsyncadd (!%p2367_p3), %s1826_s29, 4294967168  ;;  %s51_s23 = sadd.s32 1, %s3057_s23   ;;  %s4121_s29 = sld [smem:[#allocation38_spill]] }
 0xc35   : > { %p48_p6 = scmp.ge.s32.totalorder %s51_s23, 6   ;;  %s4122_s20 = sld [smem:[#allocation46_spill]] }
 0xc36   : > { %s4123_s8 = sld [smem:[#allocation40_spill]]  ;;  %s4124_s18 = sld [smem:[#allocation47_spill]] }
 0xc37   : > { %s4125_s13 = sld [smem:[#allocation44_spill]]  ;;  %s4126_s1 = sld [smem:[#allocation45_spill]] }
 0xc38   : > { %s4127_s30 = smov %s3025_s15  ;;  %s4129_s16 = smov %s3033_s17 }
 0xc39   : > { %s4131_s19 = smov %s3049_s21  ;;  %50 = sbr.rel (!%p48_p6) target bundleno = 35 (0x23), region = 286 }
 0xc3b   : > { %s4128_s15 = smov %s4122_s20  ;;  %s4132_s20 = smov %s3053_s22 }
 0xc3c   : > { %s4130_s17 = smov %s4123_s8 }
 0xc3d   : > { %s4133_s21 = smov %s4125_s13  ;;  %s4134_s22 = smov %s4126_s1 }
 0xc40   :  { %1831 = vsyncpa [#allocation5], 1 }
 0xc41   :  { %1833 = vsyncpa [#allocation5 + $0x1], 1 }
 0xc42   :  { %1834 = vsyncpa [#allocation8], 1 }
 0xc43   :  { %1836 = vsyncpa [#allocation8 + $0x1], 1 }
 0xc44   :  { %1837 = vsyncpa [#allocation11], 1 }
 0xc45   :  { %1839 = vsyncpa [#allocation11 + $0x1], 1 }
 0xc46   :  { %1840 = vsyncpa [#allocation14], 1 }
 0xc47   :  { %1842 = vsyncpa [#allocation14 + $0x1], 1 }
 0xc48   :  { %1843 = vsyncpa [#allocation17], 1 }
 0xc49   :  { %1845 = vsyncpa [#allocation17 + $0x1], 1 }
 0xc4a   :  { %1846 = vsyncpa [#allocation20], 1 }
 0xc4b   :  { %1848 = vsyncpa [#allocation20 + $0x1], 1 }
 0xc4c   :  { %1849 = vsyncpa [#allocation23], 1 }
 0xc4d   :  { %1851 = vsyncpa [#allocation23 + $0x1], 1 }
 0xc4e   :  { %1852 = vsyncpa [#allocation26], 1 }
 0xc4f   :  { %1854 = vsyncpa [#allocation26 + $0x1], 1 }
 0xc50   :  { %1855 = vsyncpa [#allocation6], 1 }
 0xc51   :  { %1857 = vsyncpa [#allocation6 + $0x1], 1 }

</bundles_post_ra>
